<compile_context>
chip_gen: v6e
topology: v6e:2x2x1
jax: 0.10.0
libtpu: 0.0.40
codegen_flags: <defaults>
</compile_context>

<pallas_src>
import jax
import jax.numpy as jnp
from jax.experimental import pallas as pl
from jax.experimental.pallas import tpu as pltpu


# ----------------------------------------------------------------------------
# Pallas kernel factory: whole GRU sequence + fused heads in one invocation.
# ----------------------------------------------------------------------------
def _make_gru_kernel(T, B, G):
    """T timesteps, B batch, G = lane-aligned per-gate stride (padded hidden)."""

    def kernel(
        x_ref,       # (T*B, 1)  time-major flattened inputs (row = t*B + b)
        w_ih_ref,    # (1, 3G)   fused input->gate weights (r|z|n, lane-padded)
        w_hh_ref,    # (G, 3G)   fused hidden->gate weights (transposed, padded)
        b_gi_ref,    # (1, 3G)   pre-folded input-side biases (r,z: b_ih+b_hh; n: b_in)
        b_hn_ref,    # (1, 3G)   hidden-side bias for n gate only (rest zero)
        w_head_ref,  # (G, P)    fused head weights (mu|sigma|lamb | zero pad)
        b_head_ref,  # (1, P)    fused head biases  (zero padded)
        out_ref,     # (T*B, P)  fused, lane-dense outputs
        gi_ref,      # (T*B, 3G) VMEM scratch: precomputed input->gate terms
        hs_ref,      # (T*B, G)  VMEM scratch: per-step hidden states
    ):
        # Input->gate term for ALL timesteps at once (off the serial chain).
        gi_ref[...] = x_ref[...] * w_ih_ref[...] + b_gi_ref[...]

        # Hoist loop-invariant weight loads.
        w_hh = w_hh_ref[...]
        b_hn = b_hn_ref[...]

        def step(t, h):
            row = pl.multiple_of(t * B, B)
            gi = gi_ref[pl.ds(row, B), :]                        # (B, 3G)

            # Recurrence matmul: (B,G)x(G,3G) on the MXU, f32 accumulate.
            gh = jnp.dot(h, w_hh, preferred_element_type=jnp.float32) + b_hn

            # Fused r|z sigmoid over one contiguous, lane-aligned [0:2G] slab.
            rz = jax.nn.sigmoid(gi[:, 0:2 * G] + gh[:, 0:2 * G])
            r = rz[:, 0:G]
            z = rz[:, G:2 * G]
            n = jnp.tanh(gi[:, 2 * G:3 * G] + r * gh[:, 2 * G:3 * G])
            h_new = n + z * (h - n)                              # (B, G)

            hs_ref[pl.ds(row, B), :] = h_new
            return h_new

        h0 = jnp.zeros((B, G), jnp.float32)                      # init_hidden: zeros
        jax.lax.fori_loop(0, T, step, h0, unroll=True)

        # Single fused head matmul over the whole sequence + one lane-dense store.
        out_ref[...] = (
            jnp.dot(hs_ref[...], w_head_ref[...], preferred_element_type=jnp.float32)
            + b_head_ref[...]
        )

    return kernel


# ----------------------------------------------------------------------------
# Wrapper: parameter fusion / lane padding (glue) + pallas_call.
# ----------------------------------------------------------------------------
def gru_rnn_forward(x, params):
    """x: (B, T, 1) float32, batch-first like the PyTorch module."""
    B, T, _ = x.shape
    H = params["w_hh"].shape[1]
    O = params["w_mu"].shape[0]
    G = 128 * ((H + 127) // 128)          # lane-aligned per-gate stride / padded hidden
    P = 128 * ((3 * O + 127) // 128)      # lane-dense fused head width

    w_ih, w_hh = params["w_ih"], params["w_hh"]
    b_ih, b_hh = params["b_ih"], params["b_hh"]

    # Per-gate lane-aligned packing (gate order r|z|n; gate g lives at [g*G, g*G+H)).
    w_ih_row = jnp.zeros((1, 3 * G), jnp.float32)
    b_gi_row = jnp.zeros((1, 3 * G), jnp.float32)
    b_hn_row = jnp.zeros((1, 3 * G), jnp.float32)
    w_hh_pad = jnp.zeros((G, 3 * G), jnp.float32)
    for g in range(3):
        cols = slice(g * G, g * G + H)
        rows = slice(g * H, (g + 1) * H)
        w_ih_row = w_ih_row.at[0, cols].set(w_ih[rows, 0])
        w_hh_pad = w_hh_pad.at[:H, cols].set(w_hh[rows, :].T)
        if g < 2:   # r, z: both biases fold into the precomputed input-side term
            b_gi_row = b_gi_row.at[0, cols].set(b_ih[rows] + b_hh[rows])
        else:       # n: b_hn must stay inside r * (W_hn h + b_hn)
            b_gi_row = b_gi_row.at[0, cols].set(b_ih[rows])
            b_hn_row = b_hn_row.at[0, cols].set(b_hh[rows])

    # Fused + zero-padded heads: columns [mu | sigma | lamb | 0...], rows H -> G.
    w_head = jnp.concatenate(
        [params["w_mu"].T, params["w_sigma"].T, params["w_lamb"].T], axis=1)   # (H, 3O)
    b_head = jnp.concatenate(
        [params["b_mu"], params["b_sigma"], params["b_lamb"]])                 # (3O,)
    w_head_pad = jnp.zeros((G, P), jnp.float32).at[:H, :3 * O].set(w_head)
    b_head_row = jnp.zeros((1, P), jnp.float32).at[0, :3 * O].set(b_head)

    # Time-major flattened inputs: row index = t*B + b.
    x_flat = jnp.transpose(x, (1, 0, 2)).reshape(T * B, 1)

    vmem = pl.BlockSpec(memory_space=pltpu.MemorySpace.VMEM)
    out_flat = pl.pallas_call(
        _make_gru_kernel(T, B, G),
        out_shape=jax.ShapeDtypeStruct((T * B, P), jnp.float32),
        in_specs=[vmem] * 7,
        out_specs=vmem,
        scratch_shapes=[
            pltpu.VMEM((T * B, 3 * G), jnp.float32),   # gi_all
            pltpu.VMEM((T * B, G), jnp.float32),       # hidden states
        ],
    )(x_flat, w_ih_row, w_hh_pad, b_gi_row, b_hn_row, w_head_pad, b_head_row)

    # Single epilogue reshape/transpose back to batch-first, then slice the heads.
    out_bf = out_flat.reshape(T, B, P).transpose(1, 0, 2)        # (B, T, P)
    mu = out_bf[..., 0:O]
    sig = out_bf[..., O:2 * O]
    lam = out_bf[..., 2 * O:3 * O]
    return mu, sig, lam


gru_rnn_forward_jit = jax.jit(gru_rnn_forward)


# ----------------------------------------------------------------------------
# Pure-JAX reference (for correctness check only).
# ----------------------------------------------------------------------------
def gru_rnn_reference(x, params):
    B, T, _ = x.shape
    H = params["w_hh"].shape[1]
    w_ih, w_hh = params["w_ih"], params["w_hh"]
    b_ih, b_hh = params["b_ih"], params["b_hh"]

    def step(h, xt):
        gi = xt @ w_ih.T + b_ih                       # (B, 3H)
        gh = h @ w_hh.T + b_hh                        # (B, 3H)
        r = jax.nn.sigmoid(gi[:, :H] + gh[:, :H])
        z = jax.nn.sigmoid(gi[:, H:2 * H] + gh[:, H:2 * H])
        n = jnp.tanh(gi[:, 2 * H:] + r * gh[:, 2 * H:])
        h_new = (1.0 - z) * n + z * h
        return h_new, h_new

    h0 = jnp.zeros((B, H), jnp.float32)
    _, hs = jax.lax.scan(step, h0, jnp.transpose(x, (1, 0, 2)))  # (T, B, H)
    hs = jnp.transpose(hs, (1, 0, 2))                            # (B, T, H)
    mu = hs @ params["w_mu"].T + params["b_mu"]
    sig = hs @ params["w_sigma"].T + params["b_sigma"]
    lam = hs @ params["w_lamb"].T + params["b_lamb"]
    return mu, sig, lam


def init_params(key, n_hidden, n_out, dim_in=1):
    """Deterministic init mirroring PyTorch default GRU/Linear uniform init."""
    ks = jax.random.split(key, 10)
    kgru = 1.0 / jnp.sqrt(n_hidden)
    klin = 1.0 / jnp.sqrt(n_hidden)
    u = lambda k, shape, bound: jax.random.uniform(k, shape, jnp.float32, -bound, bound)
    return {
        "w_ih": u(ks[0], (3 * n_hidden, dim_in), kgru),
        "w_hh": u(ks[1], (3 * n_hidden, n_hidden), kgru),
        "b_ih": u(ks[2], (3 * n_hidden,), kgru),
        "b_hh": u(ks[3], (3 * n_hidden,), kgru),
        "w_mu": u(ks[4], (n_out, n_hidden), klin),
        "b_mu": u(ks[5], (n_out,), klin),
        "w_sigma": u(ks[6], (n_out, n_hidden), klin),
        "b_sigma": u(ks[7], (n_out,), klin),
        "w_lamb": u(ks[8], (n_out, n_hidden), klin),
        "b_lamb": u(ks[9], (n_out,), klin),
    }


if __name__ == "__main__":
    B, T, H, O = 8, 8, 64, 11   # batch, seq, n_hidden, n_out (dim_in = 1)

    key = jax.random.PRNGKey(0)
    kx, kp = jax.random.split(key)
    x = jax.random.normal(kx, (B, T, 1), jnp.float32)
    params = init_params(kp, n_hidden=H, n_out=O, dim_in=1)

    mu, sig, lam = gru_rnn_forward_jit(x, params)
    jax.block_until_ready((mu, sig, lam))

    mu_r, sig_r, lam_r = gru_rnn_reference(x, params)
    assert mu.shape == (B, T, O) and sig.shape == (B, T, O) and lam.shape == (B, T, O)
    assert jnp.allclose(mu, mu_r, atol=1e-3, rtol=1e-3)
    assert jnp.allclose(sig, sig_r, atol=1e-3, rtol=1e-3)
    assert jnp.allclose(lam, lam_r, atol=1e-3, rtol=1e-3)

    print("KERNEL_OK")
</pallas_src>

<mosaic_0001>
module attributes {stable_mosaic.version = 11 : i64} {
  func.func @kernel(%arg0: memref<64x1xf32, #tpu.memory_space<vmem>>, %arg1: memref<1x384xf32, #tpu.memory_space<vmem>>, %arg2: memref<128x384xf32, #tpu.memory_space<vmem>>, %arg3: memref<1x384xf32, #tpu.memory_space<vmem>>, %arg4: memref<1x384xf32, #tpu.memory_space<vmem>>, %arg5: memref<128x128xf32, #tpu.memory_space<vmem>>, %arg6: memref<1x128xf32, #tpu.memory_space<vmem>>, %arg7: memref<64x128xf32, #tpu.memory_space<vmem>>, %arg8: memref<64x384xf32, #tpu.memory_space<vmem>>, %arg9: memref<64x128xf32, #tpu.memory_space<vmem>>) attributes {dimension_semantics = [], scalar_prefetch = 0 : i64, scratch_operands = 2 : i64, tpu.core_type = #tpu.core_type<tc>} {
    %c0 = arith.constant 0 : index
    %c0_0 = arith.constant 0 : index
    %0 = vector.load %arg0[%c0, %c0_0] : memref<64x1xf32, #tpu.memory_space<vmem>>, vector<64x1xf32>
    %c0_1 = arith.constant 0 : index
    %c0_2 = arith.constant 0 : index
    %1 = vector.load %arg1[%c0_1, %c0_2] : memref<1x384xf32, #tpu.memory_space<vmem>>, vector<1x384xf32>
    %2 = vector.broadcast %0 : vector<64x1xf32> to vector<64x384xf32>
    %3 = vector.broadcast %1 : vector<1x384xf32> to vector<64x384xf32>
    %4 = arith.mulf %2, %3 : vector<64x384xf32>
    %c0_3 = arith.constant 0 : index
    %c0_4 = arith.constant 0 : index
    %5 = vector.load %arg3[%c0_3, %c0_4] : memref<1x384xf32, #tpu.memory_space<vmem>>, vector<1x384xf32>
    %6 = vector.broadcast %5 : vector<1x384xf32> to vector<64x384xf32>
    %7 = arith.addf %4, %6 : vector<64x384xf32>
    %c0_5 = arith.constant 0 : index
    %c0_6 = arith.constant 0 : index
    %8 = vector.load %arg8[%c0_5, %c0_6] : memref<64x384xf32, #tpu.memory_space<vmem>>, vector<64x384xf32>
    tpu.vector_store %arg8[%c0_5, %c0_6], %7 {strides = array<i32>} : memref<64x384xf32, #tpu.memory_space<vmem>>, vector<64x384xf32>,
    %c0_7 = arith.constant 0 : index
    %c0_8 = arith.constant 0 : index
    %9 = vector.load %arg2[%c0_7, %c0_8] : memref<128x384xf32, #tpu.memory_space<vmem>>, vector<128x384xf32>
    %c0_9 = arith.constant 0 : index
    %c0_10 = arith.constant 0 : index
    %10 = vector.load %arg4[%c0_9, %c0_10] : memref<1x384xf32, #tpu.memory_space<vmem>>, vector<1x384xf32>
    %cst = arith.constant 0.000000e+00 : f32
    %11 = vector.broadcast %cst : f32 to vector<8x128xf32>
    %c0_i32 = arith.constant 0 : i32
    %c8_i32 = arith.constant 8 : i32
    %12 = arith.muli %c0_i32, %c8_i32 : i32
    %13 = tpu.assume_multiple %12, 8 : i32
    %14 = arith.index_cast %13 : i32 to index
    %c0_11 = arith.constant 0 : index
    %15 = vector.load %arg8[%14, %c0_11] : memref<64x384xf32, #tpu.memory_space<vmem>>, vector<8x384xf32>
    %cst_12 = arith.constant dense<0.000000e+00> : vector<8x384xf32>
    %16 = tpu.matmul %11, %9, %cst_12 {dimension_numbers = #tpu.dot_dimension_numbers<[1], [0], [0], [1], [0, 0, 1, 1], [], []>} : vector<8x128xf32>, vector<128x384xf32>, vector<8x384xf32> -> vector<8x384xf32>
    %17 = vector.broadcast %10 : vector<1x384xf32> to vector<8x384xf32>
    %18 = arith.addf %16, %17 : vector<8x384xf32>
    %19 = vector.extract_strided_slice %15 {offsets = [0, 0], sizes = [8, 256], strides = [1, 1]} : vector<8x384xf32> to vector<8x256xf32>
    %20 = vector.extract_strided_slice %18 {offsets = [0, 0], sizes = [8, 256], strides = [1, 1]} : vector<8x384xf32> to vector<8x256xf32>
    %21 = arith.addf %19, %20 : vector<8x256xf32>
    %22 = arith.negf %21 : vector<8x256xf32>
    %23 = math.exp %22 : vector<8x256xf32>
    %cst_13 = arith.constant 1.000000e+00 : f32
    %24 = vector.broadcast %cst_13 : f32 to vector<8x256xf32>
    %25 = arith.addf %24, %23 : vector<8x256xf32>
    %26 = arith.divf %24, %25 : vector<8x256xf32>
    %27 = vector.extract_strided_slice %26 {offsets = [0, 0], sizes = [8, 128], strides = [1, 1]} : vector<8x256xf32> to vector<8x128xf32>
    %28 = vector.extract_strided_slice %26 {offsets = [0, 128], sizes = [8, 128], strides = [1, 1]} : vector<8x256xf32> to vector<8x128xf32>
    %29 = vector.extract_strided_slice %15 {offsets = [0, 256], sizes = [8, 128], strides = [1, 1]} : vector<8x384xf32> to vector<8x128xf32>
    %30 = vector.extract_strided_slice %18 {offsets = [0, 256], sizes = [8, 128], strides = [1, 1]} : vector<8x384xf32> to vector<8x128xf32>
    %31 = arith.mulf %27, %30 : vector<8x128xf32>
    %32 = arith.addf %29, %31 : vector<8x128xf32>
    %33 = math.tanh %32 : vector<8x128xf32>
    %34 = arith.subf %11, %33 : vector<8x128xf32>
    %35 = arith.mulf %28, %34 : vector<8x128xf32>
    %36 = arith.addf %33, %35 : vector<8x128xf32>
    %37 = arith.index_cast %13 : i32 to index
    %c0_14 = arith.constant 0 : index
    %38 = vector.load %arg9[%37, %c0_14] : memref<64x128xf32, #tpu.memory_space<vmem>>, vector<8x128xf32>
    tpu.vector_store %arg9[%37, %c0_14], %36 {strides = array<i32>} : memref<64x128xf32, #tpu.memory_space<vmem>>, vector<8x128xf32>,
    %c1_i32 = arith.constant 1 : i32
    %c8_i32_15 = arith.constant 8 : i32
    %39 = arith.muli %c1_i32, %c8_i32_15 : i32
    %40 = tpu.assume_multiple %39, 8 : i32
    %41 = arith.index_cast %40 : i32 to index
    %c0_16 = arith.constant 0 : index
    %42 = vector.load %arg8[%41, %c0_16] : memref<64x384xf32, #tpu.memory_space<vmem>>, vector<8x384xf32>
    %cst_17 = arith.constant dense<0.000000e+00> : vector<8x384xf32>
    %43 = tpu.matmul %36, %9, %cst_17 {dimension_numbers = #tpu.dot_dimension_numbers<[1], [0], [0], [1], [0, 0, 1, 1], [], []>} : vector<8x128xf32>, vector<128x384xf32>, vector<8x384xf32> -> vector<8x384xf32>
    %44 = vector.broadcast %10 : vector<1x384xf32> to vector<8x384xf32>
    %45 = arith.addf %43, %44 : vector<8x384xf32>
    %46 = vector.extract_strided_slice %42 {offsets = [0, 0], sizes = [8, 256], strides = [1, 1]} : vector<8x384xf32> to vector<8x256xf32>
    %47 = vector.extract_strided_slice %45 {offsets = [0, 0], sizes = [8, 256], strides = [1, 1]} : vector<8x384xf32> to vector<8x256xf32>
    %48 = arith.addf %46, %47 : vector<8x256xf32>
    %49 = arith.negf %48 : vector<8x256xf32>
    %50 = math.exp %49 : vector<8x256xf32>
    %cst_18 = arith.constant 1.000000e+00 : f32
    %51 = vector.broadcast %cst_18 : f32 to vector<8x256xf32>
    %52 = arith.addf %51, %50 : vector<8x256xf32>
    %53 = arith.divf %51, %52 : vector<8x256xf32>
    %54 = vector.extract_strided_slice %53 {offsets = [0, 0], sizes = [8, 128], strides = [1, 1]} : vector<8x256xf32> to vector<8x128xf32>
    %55 = vector.extract_strided_slice %53 {offsets = [0, 128], sizes = [8, 128], strides = [1, 1]} : vector<8x256xf32> to vector<8x128xf32>
    %56 = vector.extract_strided_slice %42 {offsets = [0, 256], sizes = [8, 128], strides = [1, 1]} : vector<8x384xf32> to vector<8x128xf32>
    %57 = vector.extract_strided_slice %45 {offsets = [0, 256], sizes = [8, 128], strides = [1, 1]} : vector<8x384xf32> to vector<8x128xf32>
    %58 = arith.mulf %54, %57 : vector<8x128xf32>
    %59 = arith.addf %56, %58 : vector<8x128xf32>
    %60 = math.tanh %59 : vector<8x128xf32>
    %61 = arith.subf %36, %60 : vector<8x128xf32>
    %62 = arith.mulf %55, %61 : vector<8x128xf32>
    %63 = arith.addf %60, %62 : vector<8x128xf32>
    %64 = arith.index_cast %40 : i32 to index
    %c0_19 = arith.constant 0 : index
    %65 = vector.load %arg9[%64, %c0_19] : memref<64x128xf32, #tpu.memory_space<vmem>>, vector<8x128xf32>
    tpu.vector_store %arg9[%64, %c0_19], %63 {strides = array<i32>} : memref<64x128xf32, #tpu.memory_space<vmem>>, vector<8x128xf32>,
    %c2_i32 = arith.constant 2 : i32
    %c8_i32_20 = arith.constant 8 : i32
    %66 = arith.muli %c2_i32, %c8_i32_20 : i32
    %67 = tpu.assume_multiple %66, 8 : i32
    %68 = arith.index_cast %67 : i32 to index
    %c0_21 = arith.constant 0 : index
    %69 = vector.load %arg8[%68, %c0_21] : memref<64x384xf32, #tpu.memory_space<vmem>>, vector<8x384xf32>
    %cst_22 = arith.constant dense<0.000000e+00> : vector<8x384xf32>
    %70 = tpu.matmul %63, %9, %cst_22 {dimension_numbers = #tpu.dot_dimension_numbers<[1], [0], [0], [1], [0, 0, 1, 1], [], []>} : vector<8x128xf32>, vector<128x384xf32>, vector<8x384xf32> -> vector<8x384xf32>
    %71 = vector.broadcast %10 : vector<1x384xf32> to vector<8x384xf32>
    %72 = arith.addf %70, %71 : vector<8x384xf32>
    %73 = vector.extract_strided_slice %69 {offsets = [0, 0], sizes = [8, 256], strides = [1, 1]} : vector<8x384xf32> to vector<8x256xf32>
    %74 = vector.extract_strided_slice %72 {offsets = [0, 0], sizes = [8, 256], strides = [1, 1]} : vector<8x384xf32> to vector<8x256xf32>
    %75 = arith.addf %73, %74 : vector<8x256xf32>
    %76 = arith.negf %75 : vector<8x256xf32>
    %77 = math.exp %76 : vector<8x256xf32>
    %cst_23 = arith.constant 1.000000e+00 : f32
    %78 = vector.broadcast %cst_23 : f32 to vector<8x256xf32>
    %79 = arith.addf %78, %77 : vector<8x256xf32>
    %80 = arith.divf %78, %79 : vector<8x256xf32>
    %81 = vector.extract_strided_slice %80 {offsets = [0, 0], sizes = [8, 128], strides = [1, 1]} : vector<8x256xf32> to vector<8x128xf32>
    %82 = vector.extract_strided_slice %80 {offsets = [0, 128], sizes = [8, 128], strides = [1, 1]} : vector<8x256xf32> to vector<8x128xf32>
    %83 = vector.extract_strided_slice %69 {offsets = [0, 256], sizes = [8, 128], strides = [1, 1]} : vector<8x384xf32> to vector<8x128xf32>
    %84 = vector.extract_strided_slice %72 {offsets = [0, 256], sizes = [8, 128], strides = [1, 1]} : vector<8x384xf32> to vector<8x128xf32>
    %85 = arith.mulf %81, %84 : vector<8x128xf32>
    %86 = arith.addf %83, %85 : vector<8x128xf32>
    %87 = math.tanh %86 : vector<8x128xf32>
    %88 = arith.subf %63, %87 : vector<8x128xf32>
    %89 = arith.mulf %82, %88 : vector<8x128xf32>
    %90 = arith.addf %87, %89 : vector<8x128xf32>
    %91 = arith.index_cast %67 : i32 to index
    %c0_24 = arith.constant 0 : index
    %92 = vector.load %arg9[%91, %c0_24] : memref<64x128xf32, #tpu.memory_space<vmem>>, vector<8x128xf32>
    tpu.vector_store %arg9[%91, %c0_24], %90 {strides = array<i32>} : memref<64x128xf32, #tpu.memory_space<vmem>>, vector<8x128xf32>,
    %c3_i32 = arith.constant 3 : i32
    %c8_i32_25 = arith.constant 8 : i32
    %93 = arith.muli %c3_i32, %c8_i32_25 : i32
    %94 = tpu.assume_multiple %93, 8 : i32
    %95 = arith.index_cast %94 : i32 to index
    %c0_26 = arith.constant 0 : index
    %96 = vector.load %arg8[%95, %c0_26] : memref<64x384xf32, #tpu.memory_space<vmem>>, vector<8x384xf32>
    %cst_27 = arith.constant dense<0.000000e+00> : vector<8x384xf32>
    %97 = tpu.matmul %90, %9, %cst_27 {dimension_numbers = #tpu.dot_dimension_numbers<[1], [0], [0], [1], [0, 0, 1, 1], [], []>} : vector<8x128xf32>, vector<128x384xf32>, vector<8x384xf32> -> vector<8x384xf32>
    %98 = vector.broadcast %10 : vector<1x384xf32> to vector<8x384xf32>
    %99 = arith.addf %97, %98 : vector<8x384xf32>
    %100 = vector.extract_strided_slice %96 {offsets = [0, 0], sizes = [8, 256], strides = [1, 1]} : vector<8x384xf32> to vector<8x256xf32>
    %101 = vector.extract_strided_slice %99 {offsets = [0, 0], sizes = [8, 256], strides = [1, 1]} : vector<8x384xf32> to vector<8x256xf32>
    %102 = arith.addf %100, %101 : vector<8x256xf32>
    %103 = arith.negf %102 : vector<8x256xf32>
    %104 = math.exp %103 : vector<8x256xf32>
    %cst_28 = arith.constant 1.000000e+00 : f32
    %105 = vector.broadcast %cst_28 : f32 to vector<8x256xf32>
    %106 = arith.addf %105, %104 : vector<8x256xf32>
    %107 = arith.divf %105, %106 : vector<8x256xf32>
    %108 = vector.extract_strided_slice %107 {offsets = [0, 0], sizes = [8, 128], strides = [1, 1]} : vector<8x256xf32> to vector<8x128xf32>
    %109 = vector.extract_strided_slice %107 {offsets = [0, 128], sizes = [8, 128], strides = [1, 1]} : vector<8x256xf32> to vector<8x128xf32>
    %110 = vector.extract_strided_slice %96 {offsets = [0, 256], sizes = [8, 128], strides = [1, 1]} : vector<8x384xf32> to vector<8x128xf32>
    %111 = vector.extract_strided_slice %99 {offsets = [0, 256], sizes = [8, 128], strides = [1, 1]} : vector<8x384xf32> to vector<8x128xf32>
    %112 = arith.mulf %108, %111 : vector<8x128xf32>
    %113 = arith.addf %110, %112 : vector<8x128xf32>
    %114 = math.tanh %113 : vector<8x128xf32>
    %115 = arith.subf %90, %114 : vector<8x128xf32>
    %116 = arith.mulf %109, %115 : vector<8x128xf32>
    %117 = arith.addf %114, %116 : vector<8x128xf32>
    %118 = arith.index_cast %94 : i32 to index
    %c0_29 = arith.constant 0 : index
    %119 = vector.load %arg9[%118, %c0_29] : memref<64x128xf32, #tpu.memory_space<vmem>>, vector<8x128xf32>
    tpu.vector_store %arg9[%118, %c0_29], %117 {strides = array<i32>} : memref<64x128xf32, #tpu.memory_space<vmem>>, vector<8x128xf32>,
    %c4_i32 = arith.constant 4 : i32
    %c8_i32_30 = arith.constant 8 : i32
    %120 = arith.muli %c4_i32, %c8_i32_30 : i32
    %121 = tpu.assume_multiple %120, 8 : i32
    %122 = arith.index_cast %121 : i32 to index
    %c0_31 = arith.constant 0 : index
    %123 = vector.load %arg8[%122, %c0_31] : memref<64x384xf32, #tpu.memory_space<vmem>>, vector<8x384xf32>
    %cst_32 = arith.constant dense<0.000000e+00> : vector<8x384xf32>
    %124 = tpu.matmul %117, %9, %cst_32 {dimension_numbers = #tpu.dot_dimension_numbers<[1], [0], [0], [1], [0, 0, 1, 1], [], []>} : vector<8x128xf32>, vector<128x384xf32>, vector<8x384xf32> -> vector<8x384xf32>
    %125 = vector.broadcast %10 : vector<1x384xf32> to vector<8x384xf32>
    %126 = arith.addf %124, %125 : vector<8x384xf32>
    %127 = vector.extract_strided_slice %123 {offsets = [0, 0], sizes = [8, 256], strides = [1, 1]} : vector<8x384xf32> to vector<8x256xf32>
    %128 = vector.extract_strided_slice %126 {offsets = [0, 0], sizes = [8, 256], strides = [1, 1]} : vector<8x384xf32> to vector<8x256xf32>
    %129 = arith.addf %127, %128 : vector<8x256xf32>
    %130 = arith.negf %129 : vector<8x256xf32>
    %131 = math.exp %130 : vector<8x256xf32>
    %cst_33 = arith.constant 1.000000e+00 : f32
    %132 = vector.broadcast %cst_33 : f32 to vector<8x256xf32>
    %133 = arith.addf %132, %131 : vector<8x256xf32>
    %134 = arith.divf %132, %133 : vector<8x256xf32>
    %135 = vector.extract_strided_slice %134 {offsets = [0, 0], sizes = [8, 128], strides = [1, 1]} : vector<8x256xf32> to vector<8x128xf32>
    %136 = vector.extract_strided_slice %134 {offsets = [0, 128], sizes = [8, 128], strides = [1, 1]} : vector<8x256xf32> to vector<8x128xf32>
    %137 = vector.extract_strided_slice %123 {offsets = [0, 256], sizes = [8, 128], strides = [1, 1]} : vector<8x384xf32> to vector<8x128xf32>
    %138 = vector.extract_strided_slice %126 {offsets = [0, 256], sizes = [8, 128], strides = [1, 1]} : vector<8x384xf32> to vector<8x128xf32>
    %139 = arith.mulf %135, %138 : vector<8x128xf32>
    %140 = arith.addf %137, %139 : vector<8x128xf32>
    %141 = math.tanh %140 : vector<8x128xf32>
    %142 = arith.subf %117, %141 : vector<8x128xf32>
    %143 = arith.mulf %136, %142 : vector<8x128xf32>
    %144 = arith.addf %141, %143 : vector<8x128xf32>
    %145 = arith.index_cast %121 : i32 to index
    %c0_34 = arith.constant 0 : index
    %146 = vector.load %arg9[%145, %c0_34] : memref<64x128xf32, #tpu.memory_space<vmem>>, vector<8x128xf32>
    tpu.vector_store %arg9[%145, %c0_34], %144 {strides = array<i32>} : memref<64x128xf32, #tpu.memory_space<vmem>>, vector<8x128xf32>,
    %c5_i32 = arith.constant 5 : i32
    %c8_i32_35 = arith.constant 8 : i32
    %147 = arith.muli %c5_i32, %c8_i32_35 : i32
    %148 = tpu.assume_multiple %147, 8 : i32
    %149 = arith.index_cast %148 : i32 to index
    %c0_36 = arith.constant 0 : index
    %150 = vector.load %arg8[%149, %c0_36] : memref<64x384xf32, #tpu.memory_space<vmem>>, vector<8x384xf32>
    %cst_37 = arith.constant dense<0.000000e+00> : vector<8x384xf32>
    %151 = tpu.matmul %144, %9, %cst_37 {dimension_numbers = #tpu.dot_dimension_numbers<[1], [0], [0], [1], [0, 0, 1, 1], [], []>} : vector<8x128xf32>, vector<128x384xf32>, vector<8x384xf32> -> vector<8x384xf32>
    %152 = vector.broadcast %10 : vector<1x384xf32> to vector<8x384xf32>
    %153 = arith.addf %151, %152 : vector<8x384xf32>
    %154 = vector.extract_strided_slice %150 {offsets = [0, 0], sizes = [8, 256], strides = [1, 1]} : vector<8x384xf32> to vector<8x256xf32>
    %155 = vector.extract_strided_slice %153 {offsets = [0, 0], sizes = [8, 256], strides = [1, 1]} : vector<8x384xf32> to vector<8x256xf32>
    %156 = arith.addf %154, %155 : vector<8x256xf32>
    %157 = arith.negf %156 : vector<8x256xf32>
    %158 = math.exp %157 : vector<8x256xf32>
    %cst_38 = arith.constant 1.000000e+00 : f32
    %159 = vector.broadcast %cst_38 : f32 to vector<8x256xf32>
    %160 = arith.addf %159, %158 : vector<8x256xf32>
    %161 = arith.divf %159, %160 : vector<8x256xf32>
    %162 = vector.extract_strided_slice %161 {offsets = [0, 0], sizes = [8, 128], strides = [1, 1]} : vector<8x256xf32> to vector<8x128xf32>
    %163 = vector.extract_strided_slice %161 {offsets = [0, 128], sizes = [8, 128], strides = [1, 1]} : vector<8x256xf32> to vector<8x128xf32>
    %164 = vector.extract_strided_slice %150 {offsets = [0, 256], sizes = [8, 128], strides = [1, 1]} : vector<8x384xf32> to vector<8x128xf32>
    %165 = vector.extract_strided_slice %153 {offsets = [0, 256], sizes = [8, 128], strides = [1, 1]} : vector<8x384xf32> to vector<8x128xf32>
    %166 = arith.mulf %162, %165 : vector<8x128xf32>
    %167 = arith.addf %164, %166 : vector<8x128xf32>
    %168 = math.tanh %167 : vector<8x128xf32>
    %169 = arith.subf %144, %168 : vector<8x128xf32>
    %170 = arith.mulf %163, %169 : vector<8x128xf32>
    %171 = arith.addf %168, %170 : vector<8x128xf32>
    %172 = arith.index_cast %148 : i32 to index
    %c0_39 = arith.constant 0 : index
    %173 = vector.load %arg9[%172, %c0_39] : memref<64x128xf32, #tpu.memory_space<vmem>>, vector<8x128xf32>
    tpu.vector_store %arg9[%172, %c0_39], %171 {strides = array<i32>} : memref<64x128xf32, #tpu.memory_space<vmem>>, vector<8x128xf32>,
    %c6_i32 = arith.constant 6 : i32
    %c8_i32_40 = arith.constant 8 : i32
    %174 = arith.muli %c6_i32, %c8_i32_40 : i32
    %175 = tpu.assume_multiple %174, 8 : i32
    %176 = arith.index_cast %175 : i32 to index
    %c0_41 = arith.constant 0 : index
    %177 = vector.load %arg8[%176, %c0_41] : memref<64x384xf32, #tpu.memory_space<vmem>>, vector<8x384xf32>
    %cst_42 = arith.constant dense<0.000000e+00> : vector<8x384xf32>
    %178 = tpu.matmul %171, %9, %cst_42 {dimension_numbers = #tpu.dot_dimension_numbers<[1], [0], [0], [1], [0, 0, 1, 1], [], []>} : vector<8x128xf32>, vector<128x384xf32>, vector<8x384xf32> -> vector<8x384xf32>
    %179 = vector.broadcast %10 : vector<1x384xf32> to vector<8x384xf32>
    %180 = arith.addf %178, %179 : vector<8x384xf32>
    %181 = vector.extract_strided_slice %177 {offsets = [0, 0], sizes = [8, 256], strides = [1, 1]} : vector<8x384xf32> to vector<8x256xf32>
    %182 = vector.extract_strided_slice %180 {offsets = [0, 0], sizes = [8, 256], strides = [1, 1]} : vector<8x384xf32> to vector<8x256xf32>
    %183 = arith.addf %181, %182 : vector<8x256xf32>
    %184 = arith.negf %183 : vector<8x256xf32>
    %185 = math.exp %184 : vector<8x256xf32>
    %cst_43 = arith.constant 1.000000e+00 : f32
    %186 = vector.broadcast %cst_43 : f32 to vector<8x256xf32>
    %187 = arith.addf %186, %185 : vector<8x256xf32>
    %188 = arith.divf %186, %187 : vector<8x256xf32>
    %189 = vector.extract_strided_slice %188 {offsets = [0, 0], sizes = [8, 128], strides = [1, 1]} : vector<8x256xf32> to vector<8x128xf32>
    %190 = vector.extract_strided_slice %188 {offsets = [0, 128], sizes = [8, 128], strides = [1, 1]} : vector<8x256xf32> to vector<8x128xf32>
    %191 = vector.extract_strided_slice %177 {offsets = [0, 256], sizes = [8, 128], strides = [1, 1]} : vector<8x384xf32> to vector<8x128xf32>
    %192 = vector.extract_strided_slice %180 {offsets = [0, 256], sizes = [8, 128], strides = [1, 1]} : vector<8x384xf32> to vector<8x128xf32>
    %193 = arith.mulf %189, %192 : vector<8x128xf32>
    %194 = arith.addf %191, %193 : vector<8x128xf32>
    %195 = math.tanh %194 : vector<8x128xf32>
    %196 = arith.subf %171, %195 : vector<8x128xf32>
    %197 = arith.mulf %190, %196 : vector<8x128xf32>
    %198 = arith.addf %195, %197 : vector<8x128xf32>
    %199 = arith.index_cast %175 : i32 to index
    %c0_44 = arith.constant 0 : index
    %200 = vector.load %arg9[%199, %c0_44] : memref<64x128xf32, #tpu.memory_space<vmem>>, vector<8x128xf32>
    tpu.vector_store %arg9[%199, %c0_44], %198 {strides = array<i32>} : memref<64x128xf32, #tpu.memory_space<vmem>>, vector<8x128xf32>,
    %c7_i32 = arith.constant 7 : i32
    %c8_i32_45 = arith.constant 8 : i32
    %201 = arith.muli %c7_i32, %c8_i32_45 : i32
    %202 = tpu.assume_multiple %201, 8 : i32
    %203 = arith.index_cast %202 : i32 to index
    %c0_46 = arith.constant 0 : index
    %204 = vector.load %arg8[%203, %c0_46] : memref<64x384xf32, #tpu.memory_space<vmem>>, vector<8x384xf32>
    %cst_47 = arith.constant dense<0.000000e+00> : vector<8x384xf32>
    %205 = tpu.matmul %198, %9, %cst_47 {dimension_numbers = #tpu.dot_dimension_numbers<[1], [0], [0], [1], [0, 0, 1, 1], [], []>} : vector<8x128xf32>, vector<128x384xf32>, vector<8x384xf32> -> vector<8x384xf32>
    %206 = vector.broadcast %10 : vector<1x384xf32> to vector<8x384xf32>
    %207 = arith.addf %205, %206 : vector<8x384xf32>
    %208 = vector.extract_strided_slice %204 {offsets = [0, 0], sizes = [8, 256], strides = [1, 1]} : vector<8x384xf32> to vector<8x256xf32>
    %209 = vector.extract_strided_slice %207 {offsets = [0, 0], sizes = [8, 256], strides = [1, 1]} : vector<8x384xf32> to vector<8x256xf32>
    %210 = arith.addf %208, %209 : vector<8x256xf32>
    %211 = arith.negf %210 : vector<8x256xf32>
    %212 = math.exp %211 : vector<8x256xf32>
    %cst_48 = arith.constant 1.000000e+00 : f32
    %213 = vector.broadcast %cst_48 : f32 to vector<8x256xf32>
    %214 = arith.addf %213, %212 : vector<8x256xf32>
    %215 = arith.divf %213, %214 : vector<8x256xf32>
    %216 = vector.extract_strided_slice %215 {offsets = [0, 0], sizes = [8, 128], strides = [1, 1]} : vector<8x256xf32> to vector<8x128xf32>
    %217 = vector.extract_strided_slice %215 {offsets = [0, 128], sizes = [8, 128], strides = [1, 1]} : vector<8x256xf32> to vector<8x128xf32>
    %218 = vector.extract_strided_slice %204 {offsets = [0, 256], sizes = [8, 128], strides = [1, 1]} : vector<8x384xf32> to vector<8x128xf32>
    %219 = vector.extract_strided_slice %207 {offsets = [0, 256], sizes = [8, 128], strides = [1, 1]} : vector<8x384xf32> to vector<8x128xf32>
    %220 = arith.mulf %216, %219 : vector<8x128xf32>
    %221 = arith.addf %218, %220 : vector<8x128xf32>
    %222 = math.tanh %221 : vector<8x128xf32>
    %223 = arith.subf %198, %222 : vector<8x128xf32>
    %224 = arith.mulf %217, %223 : vector<8x128xf32>
    %225 = arith.addf %222, %224 : vector<8x128xf32>
    %226 = arith.index_cast %202 : i32 to index
    %c0_49 = arith.constant 0 : index
    %227 = vector.load %arg9[%226, %c0_49] : memref<64x128xf32, #tpu.memory_space<vmem>>, vector<8x128xf32>
    tpu.vector_store %arg9[%226, %c0_49], %225 {strides = array<i32>} : memref<64x128xf32, #tpu.memory_space<vmem>>, vector<8x128xf32>,
    %c8_i32_50 = arith.constant 8 : i32
    %c0_51 = arith.constant 0 : index
    %c0_52 = arith.constant 0 : index
    %228 = vector.load %arg9[%c0_51, %c0_52] : memref<64x128xf32, #tpu.memory_space<vmem>>, vector<64x128xf32>
    %c0_53 = arith.constant 0 : index
    %c0_54 = arith.constant 0 : index
    %229 = vector.load %arg5[%c0_53, %c0_54] : memref<128x128xf32, #tpu.memory_space<vmem>>, vector<128x128xf32>
    %cst_55 = arith.constant dense<0.000000e+00> : vector<64x128xf32>
    %230 = tpu.matmul %228, %229, %cst_55 {dimension_numbers = #tpu.dot_dimension_numbers<[1], [0], [0], [1], [0, 0, 1, 1], [], []>} : vector<64x128xf32>, vector<128x128xf32>, vector<64x128xf32> -> vector<64x128xf32>
    %c0_56 = arith.constant 0 : index
    %c0_57 = arith.constant 0 : index
    %231 = vector.load %arg6[%c0_56, %c0_57] : memref<1x128xf32, #tpu.memory_space<vmem>>, vector<1x128xf32>
    %232 = vector.broadcast %231 : vector<1x128xf32> to vector<64x128xf32>
    %233 = arith.addf %230, %232 : vector<64x128xf32>
    %c0_58 = arith.constant 0 : index
    %c0_59 = arith.constant 0 : index
    %234 = vector.load %arg7[%c0_58, %c0_59] : memref<64x128xf32, #tpu.memory_space<vmem>>, vector<64x128xf32>
    tpu.vector_store %arg7[%c0_58, %c0_59], %233 {strides = array<i32>} : memref<64x128xf32, #tpu.memory_space<vmem>>, vector<64x128xf32>,
    return
  }
}

</mosaic_0001>

<bundles_post_ra>
// kernel: gru_rnn_forward.1
= control target key start
LH: loop header
LB: loop body
LE: loop exit
PB: predicated region body
PF: predicated region fallthrough
CT: control target
= control target key end

     0   :  { %v3696_v3 = vmov 0.0   ;;  %v2386_v4 = vmov 0   ;;  %vm2387_vm0 = vmmov 0   ;;  %v76_v54 = vlaneseq  ;;  %s3688_s2 = inlined_call_operand.vmem [shape: f32[128,384], index: 2, kind: input, shape index: {}]   ;;  %s3689_s0 = inlined_call_operand.vmem [shape: f32[64,1], index: 0, kind: input, shape index: {}]   ;;  %s3690_s1 = inlined_call_operand.vmem [shape: f32[1,384], index: 1, kind: input, shape index: {}]   ;;  %s3691_s3 = inlined_call_operand.vmem [shape: f32[1,384], index: 3, kind: input, shape index: {}]   ;;  %s3692_s4 = inlined_call_operand.vmem [shape: f32[1,384], index: 4, kind: input, shape index: {}]   ;;  %s3693_s5 = inlined_call_operand.vmem [shape: f32[128,128], index: 5, kind: input, shape index: {}]   ;;  %s3694_s6 = inlined_call_operand.vmem [shape: f32[1,128], index: 6, kind: input, shape index: {}]   ;;  %s3695_s7 = inlined_call_operand.vmem [shape: f32[64,128], index: 7, kind: output, shape index: {}]  }
   0x1   :  { %v2431_v0 = vld [vmem:[%s3688_s2 + $0x170] sm:$0xff]  ;;  %v2436_v1 = vld [vmem:[%s3688_s2 + $0x168] sm:$0xff]  ;;  %v2441_v2 = vld [vmem:[%s3688_s2 + $0x158] sm:$0xff]  ;;  %315 = vmatprep.mubr.f32.mxu1 %v3696_v3  ;;  %2255 = vset.pattern.permute.xlu0 %v2386_v4 }
   0x2   :  { %3746 = vst [vmem:[#allocation4_spill] sm:$0xff] %v2431_v0  ;;  %251 = vmatprep.subr.mxu1 %v2431_v0  ;;  %v2449_v5 = vld [vmem:[%s3688_s2 + $0x150] sm:$0xff]  ;;  %419 = vmatprep.subr.mxu0 %v2431_v0  ;;  %v2456_v6 = vld [vmem:[%s3688_s2 + $0x140] sm:$0xff]  ;;  %v2463_v7 = vld [vmem:[%s3688_s2 + $0x138] sm:$0xff]  ;;  %v77_v55 = vshrl.u32 %v76_v54, 7 }
   0x3   :  { %252 = vmatpush1.msra.mxu1 %v2436_v1  ;;  %420 = vmatpush1.msra.mxu0 %v2436_v1  ;;  %v2470_v8 = vld [vmem:[%s3688_s2 + $0x128] sm:$0xff]  ;;  %v2477_v9 = vld [vmem:[%s3688_s2 + $0x120] sm:$0xff]  ;;  %v2484_v10 = vld [vmem:[%s3688_s2 + $0x110] sm:$0xff] }
   0x4   :  { %253 = vmatprep.subr.mxu1 %v2441_v2  ;;  %421 = vmatprep.subr.mxu0 %v2441_v2  ;;  %v2491_v11 = vld [vmem:[%s3688_s2 + $0x108] sm:$0xff]  ;;  %v2498_v12 = vld [vmem:[%s3688_s2 + $0xf8] sm:$0xff]  ;;  %v2505_v13 = vld [vmem:[%s3688_s2 + $0xf0] sm:$0xff]  ;;  %v78_v56 = vsub.s32 0, %v77_v55 }
   0x5   :  { %254 = vmatpush1.msra.mxu1 %v2449_v5  ;;  %422 = vmatpush1.msra.mxu0 %v2449_v5  ;;  %v2512_v14 = vld [vmem:[%s3688_s2 + $0xe0] sm:$0xff]  ;;  %v2519_v15 = vld [vmem:[%s3688_s2 + $0xd8] sm:$0xff]  ;;  %v2526_v16 = vld [vmem:[%s3688_s2 + $0xc8] sm:$0xff] }
   0x6   :  { %255 = vmatprep.subr.mxu1 %v2456_v6  ;;  %423 = vmatprep.subr.mxu0 %v2456_v6  ;;  %v2533_v17 = vld [vmem:[%s3688_s2 + $0xc0] sm:$0xff]  ;;  %v2540_v18 = vld [vmem:[%s3688_s2 + $0xb0] sm:$0xff]  ;;  %v2547_v19 = vld [vmem:[%s3688_s2 + $0xa8] sm:$0xff] }
   0x7   :  { %256 = vmatpush1.msra.mxu1 %v2463_v7  ;;  %424 = vmatpush1.msra.mxu0 %v2463_v7  ;;  %v2554_v20 = vld [vmem:[%s3688_s2 + $0x98] sm:$0xff]  ;;  %v26_v21 = vld [vmem:[%s3689_s0] sm:$0xff]  ;;  %v2564_v22 = vld [vmem:[%s3688_s2 + $0x90] sm:$0xff] }
   0x8   :  { %257 = vmatprep.subr.mxu1 %v2470_v8  ;;  %425 = vmatprep.subr.mxu0 %v2470_v8  ;;  %v2570_v23 = vld [vmem:[%s3688_s2 + $0x80] sm:$0xff]  ;;  %v27_v24 = vld [vmem:[%s3689_s0 + $0x8] sm:$0xff]  ;;  %v2579_v25 = vld [vmem:[%s3688_s2 + $0x78] sm:$0xff] }
   0x9   :  { %258 = vmatpush1.msra.mxu1 %v2477_v9  ;;  %426 = vmatpush1.msra.mxu0 %v2477_v9  ;;  %v2586_v26 = vld [vmem:[%s3688_s2 + $0x68] sm:$0xff]  ;;  %v2593_v27 = vld [vmem:[%s3688_s2 + $0x60] sm:$0xff]  ;;  %v2599_v28 = vld [vmem:[%s3688_s2 + $0x50] sm:$0xff] }
   0xa   :  { %259 = vmatprep.subr.mxu1 %v2484_v10  ;;  %427 = vmatprep.subr.mxu0 %v2484_v10  ;;  %v30_v29 = vld [vmem:[%s3689_s0 + $0x20] sm:$0xff]  ;;  %v2609_v30 = vld [vmem:[%s3688_s2 + $0x48] sm:$0xff]  ;;  %v2616_v31 = vld [vmem:[%s3688_s2 + $0x38] sm:$0xff] }
   0xb   :  { %260 = vmatpush1.msra.mxu1 %v2491_v11  ;;  %428 = vmatpush1.msra.mxu0 %v2491_v11  ;;  %3747 = vst [vmem:[#allocation5_spill] sm:$0xff] %v2616_v31  ;;  %v2623_v32 = vld [vmem:[%s3688_s2 + $0x30] sm:$0xff]  ;;  %v2629_v33 = vld [vmem:[%s3688_s2 + $0x20] sm:$0xff]  ;;  %v2639_v35 = vld [vmem:[%s3688_s2 + $0x18] sm:$0xff] }
   0xc   :  { %261 = vmatprep.subr.mxu1 %v2498_v12  ;;  %429 = vmatprep.subr.mxu0 %v2498_v12  ;;  %3748 = vst [vmem:[#allocation6_spill] sm:$0xff] %v2623_v32  ;;  %3749 = vst [vmem:[#allocation7_spill] sm:$0xff] %v2629_v33  ;;  %v32_v34 = vld [vmem:[%s3689_s0 + $0x30] sm:$0xff]  ;;  %v2646_v36 = vld [vmem:[%s3688_s2 + $0x8] sm:$0xff] }
   0xd   :  { %262 = vmatpush1.msra.mxu1 %v2505_v13  ;;  %430 = vmatpush1.msra.mxu0 %v2505_v13  ;;  %3750 = vst [vmem:[#allocation8_spill] sm:$0xff] %v2639_v35  ;;  %3751 = vst [vmem:[#allocation9_spill] sm:$0xff] %v2646_v36  ;;  %v2653_v37 = vld [vmem:[%s3688_s2] sm:$0xff]  ;;  %v2661_v38 = vld [vmem:[%s3688_s2 + $0x178] sm:$0xff] }
   0xe   :  { %263 = vmatprep.subr.mxu1 %v2512_v14  ;;  %431 = vmatprep.subr.mxu0 %v2512_v14  ;;  %3752 = vst [vmem:[#allocation10_spill] sm:$0xff] %v2653_v37  ;;  %v2671_v39 = vld [vmem:[%s3688_s2 + $0x160] sm:$0xff]  ;;  %v2680_v40 = vld [vmem:[%s3688_s2 + $0x148] sm:$0xff]  ;;  %v2689_v41 = vld [vmem:[%s3688_s2 + $0x130] sm:$0xff] }
   0xf   :  { %264 = vmatpush1.msra.mxu1 %v2519_v15  ;;  %432 = vmatpush1.msra.mxu0 %v2519_v15  ;;  %v2698_v42 = vld [vmem:[%s3688_s2 + $0x118] sm:$0xff]  ;;  %v2707_v43 = vld [vmem:[%s3688_s2 + $0x100] sm:$0xff]  ;;  %v2716_v44 = vld [vmem:[%s3688_s2 + $0xe8] sm:$0xff] }
  0x10   :  { %265 = vmatprep.subr.mxu1 %v2526_v16  ;;  %433 = vmatprep.subr.mxu0 %v2526_v16  ;;  %v2723_v45 = vld [vmem:[%s3688_s2 + $0xd0] sm:$0xff]  ;;  %v2730_v46 = vld [vmem:[%s3688_s2 + $0xb8] sm:$0xff]  ;;  %v2737_v47 = vld [vmem:[%s3688_s2 + $0xa0] sm:$0xff] }
  0x11   :  { %266 = vmatpush1.msra.mxu1 %v2533_v17  ;;  %434 = vmatpush1.msra.mxu0 %v2533_v17  ;;  %v2744_v48 = vld [vmem:[%s3688_s2 + $0x88] sm:$0xff]  ;;  %v2751_v49 = vld [vmem:[%s3688_s2 + $0x70] sm:$0xff]  ;;  %v2758_v50 = vld [vmem:[%s3688_s2 + $0x58] sm:$0xff] }
  0x12   :  { %267 = vmatprep.subr.mxu1 %v2540_v18  ;;  %37 = vperm.xlu0 %2255, %v26_v21   ;;  %3753 = vst [vmem:[#allocation11_spill] sm:$0xff] %v2758_v50  ;;  %v2765_v51 = vld [vmem:[%s3688_s2 + $0x40] sm:$0xff]  ;;  %v2772_v52 = vld [vmem:[%s3688_s2 + $0x28] sm:$0xff]  ;;  %v2779_v53 = vld [vmem:[%s3688_s2 + $0x10] sm:$0xff] }
  0x13   :  { %268 = vmatpush1.msra.mxu1 %v2547_v19  ;;  %435 = vmatprep.subr.mxu0 %v2540_v18  ;;  %3754 = vst [vmem:[#allocation12_spill] sm:$0xff] %v2765_v51  ;;  %3755 = vst [vmem:[#allocation13_spill] sm:$0xff] %v2772_v52  ;;  %v34_v57 = vld [vmem:[%s3690_s1] sm:$0x7] }
  0x14   :  { %269 = vmatprep.subr.mxu1 %v2554_v20  ;;  %436 = vmatpush1.msra.mxu0 %v2547_v19  ;;  %3756 = vst [vmem:[#allocation14_spill] sm:$0xff] %v2779_v53  ;;  %v2823_v58 = vrot.slane %v34_v57, %v78_v56  ;;  %v115_v59 = vld [vmem:[%s3691_s3] sm:$0x7] }
  0x15   :  { %270 = vmatpush1.msra.mxu1 %v2564_v22  ;;  %437 = vmatprep.subr.mxu0 %v2554_v20  ;;  %v228_v61 = vld [vmem:[%s3692_s4] sm:$0x7]  ;;  %v2832_v63 = vrot.slane %v115_v59, %v78_v56 }
  0x16   :  { %271 = vmatprep.subr.mxu1 %v2570_v23  ;;  %42 = vperm.xlu0 %2255, %v27_v24   ;;  %3757 = vst [vmem:[#allocation15_spill] sm:$0xff] %v2823_v58  ;;  %v82_v24 = vsub.s32 1, %v77_v55 }
  0x17   :  { %272 = vmatpush1.msra.mxu1 %v2579_v25  ;;  %438 = vmatpush1.msra.mxu0 %v2564_v22  ;;  %3758 = vst [vmem:[#allocation16_spill] sm:$0xff] %v2832_v63 }
  0x18   :  { %273 = vmatprep.subr.mxu1 %v2586_v26  ;;  %439 = vmatprep.subr.mxu0 %v2570_v23 }
  0x19   :  { %274 = vmatpush1.msra.mxu1 %v2593_v27  ;;  %440 = vmatpush1.msra.mxu0 %v2579_v25 }
  0x1a   :  { %275 = vmatprep.subr.mxu1 %v2599_v28  ;;  %57 = vperm.xlu0 %2255, %v30_v29  }
  0x1b   :  { %276 = vmatpush1.msra.mxu1 %v2609_v30  ;;  %441 = vmatprep.subr.mxu0 %v2586_v26 }
  0x1c   :  { %277 = vmatprep.subr.mxu1 %v2616_v31  ;;  %442 = vmatpush1.msra.mxu0 %v2593_v27 }
  0x1d   :  { %278 = vmatpush1.msra.mxu1 %v2623_v32  ;;  %443 = vmatprep.subr.mxu0 %v2599_v28 }
  0x1e   :  { %279 = vmatprep.subr.mxu1 %v2629_v33  ;;  %67 = vperm.xlu0 %2255, %v32_v34  }
  0x1f   :  { %280 = vmatpush1.msra.mxu1 %v2639_v35  ;;  %444 = vmatpush1.msra.mxu0 %v2609_v30 }
  0x20   :  { %281 = vmatprep.subr.mxu1 %v2646_v36  ;;  %445 = vmatprep.subr.mxu0 %v2616_v31 }
  0x21   :  { %282 = vmatpush1.msra.mxu1 %v2653_v37  ;;  %446 = vmatpush1.msra.mxu0 %v2623_v32 }
  0x22   :  { %316 = vmatmul.mubr.f32.vlgmr.msra.gmra.mxu1 %v3696_v3  ;;  %1928 = vmatprep.subr.mxu1 %v3696_v3 }
  0x23   :  { %1929 = vmatpush3.msra.mxu1 %v2661_v38  ;;  %1960 = vmatprep.mubr.msk.f32.mxu1 %vm2387_vm0, %v3696_v3 }
  0x24   :  { %1930 = vmatprep.subr.mxu1 %v3696_v3  ;;  %447 = vmatprep.subr.mxu0 %v2629_v33 }
  0x25   :  { %1931 = vmatpush3.msra.mxu1 %v2671_v39  ;;  %448 = vmatpush1.msra.mxu0 %v2639_v35 }
  0x26   :  { %1932 = vmatprep.subr.mxu1 %v3696_v3  ;;  %449 = vmatprep.subr.mxu0 %v2646_v36  ;;  %v2843_v36 = vrot.slane %v115_v59, %v82_v24 }
  0x27   :  { %1933 = vmatpush3.msra.mxu1 %v2680_v40  ;;  %450 = vmatpush1.msra.mxu0 %v2653_v37 }
  0x28   :  { %1934 = vmatprep.subr.mxu1 %v3696_v3  ;;  %483 = vmatprep.mubr.f32.mxu0 %v3696_v3 }
  0x29   :  { %1935 = vmatpush3.msra.mxu1 %v2689_v41  ;;  %588 = vmatprep.subr.mxu0 %v2431_v0 }
  0x2a   :  { %1936 = vmatprep.subr.mxu1 %v3696_v3  ;;  %2256 = vset.pattern.permute.xlu1 %v2386_v4  ;;  %v2834_v4 = vrot.slane %v228_v61, %v78_v56 }
  0x2b   :  { %1937 = vmatpush3.msra.mxu1 %v2698_v42 }
  0x2c   :  { %1938 = vmatprep.subr.mxu1 %v3696_v3  ;;  %3759 = vst [vmem:[#allocation17_spill] sm:$0xff] %v2834_v4 }
  0x2d   :  { %1939 = vmatpush3.msra.mxu1 %v2707_v43 }
  0x2e   :  { %1940 = vmatprep.subr.mxu1 %v3696_v3 }
  0x2f   :  { %1941 = vmatpush3.msra.mxu1 %v2716_v44 }
  0x30   :  { %1942 = vmatprep.subr.mxu1 %v3696_v3 }
  0x31   :  { %1943 = vmatpush3.msra.mxu1 %v2723_v45 }
  0x32   :  { %1944 = vmatprep.subr.mxu1 %v3696_v3 }
  0x33   :  { %1945 = vmatpush3.msra.mxu1 %v2730_v46 }
  0x34   :  { %1946 = vmatprep.subr.mxu1 %v3696_v3 }
  0x35   :  { %1947 = vmatpush3.msra.mxu1 %v2737_v47 }
  0x36   :  { %1948 = vmatprep.subr.mxu1 %v3696_v3 }
  0x37   :  { %1949 = vmatpush3.msra.mxu1 %v2744_v48 }
  0x38   :  { %1950 = vmatprep.subr.mxu1 %v3696_v3 }
  0x39   :  { %1951 = vmatpush3.msra.mxu1 %v2751_v49 }
  0x3a   :  { %1952 = vmatprep.subr.mxu1 %v3696_v3 }
  0x3b   :  { %1953 = vmatpush3.msra.mxu1 %v2758_v50 }
  0x3c   :  { %1954 = vmatprep.subr.mxu1 %v3696_v3 }
  0x3d   :  { %1955 = vmatpush3.msra.mxu1 %v2765_v51 }
  0x3e   :  { %1956 = vmatprep.subr.mxu1 %v3696_v3 }
  0x3f   :  { %1957 = vmatpush3.msra.mxu1 %v2772_v52 }
  0x40   :  { %1958 = vmatprep.subr.mxu1 %v3696_v3 }
  0x41   :  { %1959 = vmatpush3.msra.mxu1 %v2779_v53 }
  0x42   :  { %1961 = vmatmul.mubr.f32.vlgmr.msra.gmra.mxu1 %v3696_v3  ;;  %1963 = vmatprep.subr.mxu1 %v3696_v3 }
  0x43   :  { %1964 = vmatpush3.msra.mxu1 %v2661_v38  ;;  %1995 = vmatprep.mubr.msk.f32.mxu1 %vm2387_vm0, %v3696_v3 }
  0x44   :  { %1965 = vmatprep.subr.mxu1 %v3696_v3 }
  0x45   :  { %1966 = vmatpush3.msra.mxu1 %v2671_v39 }
  0x46   :  { %1967 = vmatprep.subr.mxu1 %v3696_v3 }
  0x47   :  { %1968 = vmatpush3.msra.mxu1 %v2680_v40 }
  0x48   :  { %1969 = vmatprep.subr.mxu1 %v3696_v3 }
  0x49   :  { %1970 = vmatpush3.msra.mxu1 %v2689_v41 }
  0x4a   :  { %1971 = vmatprep.subr.mxu1 %v3696_v3 }
  0x4b   :  { %1972 = vmatpush3.msra.mxu1 %v2698_v42 }
  0x4c   :  { %1973 = vmatprep.subr.mxu1 %v3696_v3 }
  0x4d   :  { %1974 = vmatpush3.msra.mxu1 %v2707_v43 }
  0x4e   :  { %1975 = vmatprep.subr.mxu1 %v3696_v3 }
  0x4f   :  { %1976 = vmatpush3.msra.mxu1 %v2716_v44 }
  0x50   :  { %1977 = vmatprep.subr.mxu1 %v3696_v3 }
  0x51   :  { %1978 = vmatpush3.msra.mxu1 %v2723_v45 }
  0x52   :  { %1979 = vmatprep.subr.mxu1 %v3696_v3 }
  0x53   :  { %1980 = vmatpush3.msra.mxu1 %v2730_v46 }
  0x54   :  { %1981 = vmatprep.subr.mxu1 %v3696_v3 }
  0x55   :  { %1982 = vmatpush3.msra.mxu1 %v2737_v47 }
  0x56   :  { %1983 = vmatprep.subr.mxu1 %v3696_v3 }
  0x57   :  { %1984 = vmatpush3.msra.mxu1 %v2744_v48 }
  0x58   :  { %1985 = vmatprep.subr.mxu1 %v3696_v3 }
  0x59   :  { %1986 = vmatpush3.msra.mxu1 %v2751_v49 }
  0x5a   :  { %1987 = vmatprep.subr.mxu1 %v3696_v3 }
  0x5b   :  { %1988 = vmatpush3.msra.mxu1 %v2758_v50 }
  0x5c   :  { %1989 = vmatprep.subr.mxu1 %v3696_v3 }
  0x5d   :  { %1990 = vmatpush3.msra.mxu1 %v2765_v51 }
  0x5e   :  { %1991 = vmatprep.subr.mxu1 %v3696_v3 }
  0x5f   :  { %1992 = vmatpush3.msra.mxu1 %v2772_v52 }
  0x60   :  { %1993 = vmatprep.subr.mxu1 %v3696_v3 }
  0x61   :  { %1994 = vmatpush3.msra.mxu1 %v2779_v53  ;;  %v2840_v53 = vrot.slane %v228_v61, %v82_v24 }
  0x62   :  { %1998 = vmatprep.subr.mxu1 %v3696_v3  ;;  %v2838_v3 = vrot.slane %v34_v57, %v82_v24 }
  0x63   :  { %3761 = vst [vmem:[#allocation19_spill] sm:$0xff] %v2840_v53 }
  0x64   :  { %3760 = vst [vmem:[#allocation18_spill] sm:$0xff] %v2838_v3 }
  0x8d   :  { %v38_v60 = vpop.permute.xlu0 %37 }
  0x8e   :  { %v91_v62 = vmul.f32 %v2823_v58, %v38_v60  ;;  %v92_v58 = vmul.f32 %v2838_v3, %v38_v60 }
  0x90   :  { %v132_v21 = vadd.f32 %v2832_v63, %v91_v62  ;;  %v133_v62 = vadd.f32 %v2843_v36, %v92_v58 }
  0xe2   :  { %v317_v29 = vpop.f32.mrf.mxu1 }
  0xe3   :  { %v318_v34 = vadd.f32 %v317_v29, %v2834_v4 }
  0xe4   :  { %v319_v37 = vpop.f32.mrf.mxu1 }
  0xe5   :  { %v392_v54 = vadd.f32 %v318_v34, %v132_v21  ;;  %v320_v56 = vadd.f32 %v319_v37, %v2840_v53  ;;  %v86_v21 = vsub.s32 2, %v77_v55 }
  0xe7   :  { %v1751_v0 = vmul.f32 -1.442695, %v392_v54  ;;  %v393_v63 = vadd.f32 %v320_v56, %v133_v62  ;;  %v2847_v34 = vrot.slane %v34_v57, %v86_v21  ;;  %v2849_v54 = vrot.slane %v228_v61, %v86_v21 }
  0xe8   :  { %v2851_v4 = vrot.slane %v115_v59, %v86_v21  ;;  %v3765_v21 = vld [vmem:[#allocation13_spill] sm:$0xff] }
  0xe9   :  { %2257 = vpow2.f32 %v1751_v0  ;;  %v1752_v52 = vmul.f32 -1.442695, %v393_v63  ;;  %v93_v24 = vmul.f32 %v2847_v34, %v38_v60  ;;  %v3764_v60 = vld [vmem:[#allocation8_spill] sm:$0xff] }
  0xeb   :  { %2259 = vpow2.f32 %v1752_v52  ;;  %v134_v63 = vadd.f32 %v2851_v4, %v93_v24  ;;  %v3767_v24 = vld [vmem:[#allocation10_spill] sm:$0xff] }
  0xf6   :  { %v2258_v35 = vpop.eup %2257 }
  0xf7   :  { %v400_v29 = vadd.f32 1.0, %v2258_v35 }
  0xf8   :  { %v2260_v58 = vpop.eup %2259 }
  0xf9   :  { %2261 = vrcp.f32 %v400_v29  ;;  %v401_v52 = vadd.f32 1.0, %v2260_v58  ;;  %v3769_v58 = vld [vmem:[#allocation4_spill] sm:$0xff] }
 0x102   :  { %v388_v0 = vpop.f32.mrf.mxu1 }
 0x103   :  { %v389_v37 = vadd.f32 %v388_v0, %v2849_v54  ;;  %v3766_v0 = vld [vmem:[#allocation9_spill] sm:$0xff] }
 0x104   :  { %v1962_v53 = vpop.f32.mrf.mxu1 }
 0x105   :  { %v3763_v53 = vmov 0.0  }
 0x106   :  { %v2262_v56 = vpop.eup %2261 }
 0x107   :  { %v406_v35 = vmul.f32 %v2262_v56, %v389_v37  ;;  %v3768_v37 = vld [vmem:[#allocation14_spill] sm:$0xff] }
 0x108   :  { %v28_v56 = vld [vmem:[%s3689_s0 + $0x10] sm:$0xff] }
 0x109   :  { %v407_v62 = vadd.f32 %v406_v35, %v134_v63  ;;  %47 = vperm.xlu1 %2256, %v28_v56   ;;  %v29_v63 = vld [vmem:[%s3689_s0 + $0x18] sm:$0xff]  ;;  %v31_v35 = vld [vmem:[%s3689_s0 + $0x28] sm:$0xff]  ;;  %v3771_v56 = vld [vmem:[#allocation16_spill] sm:$0xff] }
 0x10b   :  { %2263 = vtanh.f32 %v407_v62  ;;  %v43_v62 = vpop.permute.xlu0 %42 }
 0x10c   :  { %2265 = vrcp.f32 %v401_v52  ;;  %v33_v52 = vld [vmem:[%s3689_s0 + $0x38] sm:$0xff] }
 0x10d   :  { %52 = vperm.xlu1 %2256, %v29_v63  }
 0x111   :  { %62 = vperm.xlu1 %2256, %v31_v35   ;;  %v95_v35 = vmul.f32 %v2838_v3, %v43_v62 }
 0x115   :  { %72 = vperm.xlu1 %2256, %v33_v52   ;;  %v136_v52 = vadd.f32 %v2843_v36, %v95_v35  ;;  %v3779_v35 = vld [vmem:[#allocation7_spill] sm:$0xff] }
 0x118   :  { %v2264_v55 = vpop.eup %2263 }
 0x119   :  { %v409_v57 = vsub.f32 0.0, %v2264_v55  ;;  %v2266_v61 = vpop.eup %2265 }
 0x11b   :  { %v410_v29 = vmul.f32 %v2266_v61, %v409_v57 }
 0x11d   :  { %v2856_v59 = vadd.f32 %v2264_v55, %v410_v29  ;;  %v3770_v55 = vld [vmem:[#allocation15_spill] sm:$0xff] }
 0x11e   :  { %v94_v57 = vmul.f32 %v3770_v55, %v43_v62 }
 0x11f   :  { %3762 = vst [vmem:[#allocation20_spill] sm:$0xff] %v2856_v59  ;;  %484 = vmatmul.mubr.f32.vlgmr.msra.gmra.mxu0 %v2856_v59  ;;  %1996 = vmatmul.mubr.f32.vlgmr.msra.gmra.mxu1 %v2856_v59 }
 0x120   :  { %589 = vmatpush1.msra.mxu0 %v2436_v1  ;;  %1999 = vmatpush3.msra.mxu1 %v2661_v38 }
 0x121   :  { %590 = vmatprep.subr.mxu0 %v2441_v2  ;;  %2000 = vmatprep.subr.mxu1 %v3763_v53 }
 0x122   :  { %591 = vmatpush1.msra.mxu0 %v2449_v5  ;;  %2001 = vmatpush3.msra.mxu1 %v2671_v39 }
 0x123   :  { %592 = vmatprep.subr.mxu0 %v2456_v6  ;;  %2002 = vmatprep.subr.mxu1 %v3763_v53 }
 0x124   :  { %593 = vmatpush1.msra.mxu0 %v2463_v7  ;;  %2003 = vmatpush3.msra.mxu1 %v2680_v40 }
 0x125   :  { %594 = vmatprep.subr.mxu0 %v2470_v8  ;;  %2004 = vmatprep.subr.mxu1 %v3763_v53 }
 0x126   :  { %595 = vmatpush1.msra.mxu0 %v2477_v9  ;;  %2005 = vmatpush3.msra.mxu1 %v2689_v41 }
 0x127   :  { %596 = vmatprep.subr.mxu0 %v2484_v10  ;;  %2006 = vmatprep.subr.mxu1 %v3763_v53 }
 0x128   :  { %597 = vmatpush1.msra.mxu0 %v2491_v11  ;;  %2007 = vmatpush3.msra.mxu1 %v2698_v42 }
 0x129   :  { %598 = vmatprep.subr.mxu0 %v2498_v12  ;;  %2008 = vmatprep.subr.mxu1 %v3763_v53 }
 0x12a   :  { %599 = vmatpush1.msra.mxu0 %v2505_v13  ;;  %2009 = vmatpush3.msra.mxu1 %v2707_v43 }
 0x12b   :  { %600 = vmatprep.subr.mxu0 %v2512_v14  ;;  %2010 = vmatprep.subr.mxu1 %v3763_v53 }
 0x12c   :  { %601 = vmatpush1.msra.mxu0 %v2519_v15  ;;  %2011 = vmatpush3.msra.mxu1 %v2716_v44 }
 0x12d   :  { %602 = vmatprep.subr.mxu0 %v2526_v16  ;;  %2012 = vmatprep.subr.mxu1 %v3763_v53 }
 0x12e   :  { %603 = vmatpush1.msra.mxu0 %v2533_v17  ;;  %2013 = vmatpush3.msra.mxu1 %v2723_v45 }
 0x12f   :  { %604 = vmatprep.subr.mxu0 %v2540_v18  ;;  %2014 = vmatprep.subr.mxu1 %v3763_v53 }
 0x130   :  { %605 = vmatpush1.msra.mxu0 %v2547_v19  ;;  %2015 = vmatpush3.msra.mxu1 %v2730_v46 }
 0x131   :  { %606 = vmatprep.subr.mxu0 %v2554_v20  ;;  %2016 = vmatprep.subr.mxu1 %v3763_v53 }
 0x132   :  { %607 = vmatpush1.msra.mxu0 %v2564_v22  ;;  %2017 = vmatpush3.msra.mxu1 %v2737_v47 }
 0x133   :  { %608 = vmatprep.subr.mxu0 %v2570_v23  ;;  %2018 = vmatprep.subr.mxu1 %v3763_v53 }
 0x134   :  { %609 = vmatpush1.msra.mxu0 %v2579_v25  ;;  %2019 = vmatpush3.msra.mxu1 %v2744_v48 }
 0x135   :  { %610 = vmatprep.subr.mxu0 %v2586_v26  ;;  %2020 = vmatprep.subr.mxu1 %v3763_v53 }
 0x136   :  { %611 = vmatpush1.msra.mxu0 %v2593_v27  ;;  %2021 = vmatpush3.msra.mxu1 %v2751_v49 }
 0x137   :  { %612 = vmatprep.subr.mxu0 %v2599_v28  ;;  %2022 = vmatprep.subr.mxu1 %v3763_v53 }
 0x138   :  { %613 = vmatpush1.msra.mxu0 %v2609_v30  ;;  %2023 = vmatpush3.msra.mxu1 %v2758_v50 }
 0x139   :  { %614 = vmatprep.subr.mxu0 %v2616_v31  ;;  %2024 = vmatprep.subr.mxu1 %v3763_v53 }
 0x13a   :  { %615 = vmatpush1.msra.mxu0 %v2623_v32  ;;  %2025 = vmatpush3.msra.mxu1 %v2765_v51 }
 0x13b   :  { %616 = vmatprep.subr.mxu0 %v2629_v33  ;;  %2026 = vmatprep.subr.mxu1 %v3763_v53  ;;  %v3773_v33 = vld [vmem:[#allocation19_spill] sm:$0xff] }
 0x13c   :  { %617 = vmatpush1.msra.mxu0 %v3764_v60  ;;  %2027 = vmatpush3.msra.mxu1 %v3765_v21 }
 0x13d   :  { %618 = vmatprep.subr.mxu0 %v3766_v0  ;;  %2028 = vmatprep.subr.mxu1 %v3763_v53 }
 0x13e   :  { %619 = vmatpush1.msra.mxu0 %v3767_v24  ;;  %652 = vmatprep.mubr.f32.mxu0 %v3763_v53 }
 0x13f   :  { %2029 = vmatpush3.msra.mxu1 %v3768_v37  ;;  %2030 = vmatprep.mubr.msk.f32.mxu1 %vm2387_vm0, %v3763_v53  ;;  %v3772_v37 = vld [vmem:[#allocation17_spill] sm:$0xff] }
 0x140   :  { %757 = vmatprep.subr.mxu0 %v3769_v58  ;;  %2033 = vmatprep.subr.mxu1 %v3763_v53  ;;  %v135_v58 = vadd.f32 %v3771_v56, %v94_v57  ;;  %v96_v57 = vmul.f32 %v2847_v34, %v43_v62  ;;  %v3777_v62 = vld [vmem:[#allocation6_spill] sm:$0xff] }
 0x1df   :  { %v485_v61 = vpop.f32.mrf.mxu0  ;;  %v556_v29 = vpop.f32.mrf.mxu1 }
 0x1e0   :  { %v486_v24 = vadd.f32 %v485_v61, %v3772_v37 }
 0x1e1   :  { %v1997_v63 = vpop.f32.mrf.mxu1  ;;  %v487_v60 = vpop.f32.mrf.mxu0 }
 0x1e2   :  { %v560_v0 = vadd.f32 %v486_v24, %v135_v58  ;;  %v488_v51 = vadd.f32 %v487_v60, %v3773_v33  ;;  %v557_v24 = vadd.f32 %v556_v29, %v2849_v54  ;;  %v3778_v29 = vld [vmem:[#allocation12_spill] sm:$0xff] }
 0x1e4   :  { %v1753_v21 = vmul.f32 -1.442695, %v560_v0  ;;  %v561_v32 = vadd.f32 %v488_v51, %v136_v52  ;;  %v3780_v52 = vld [vmem:[#allocation8_spill] sm:$0xff] }
 0x1e6   :  { %2267 = vpow2.f32 %v1753_v21  ;;  %v1754_v31 = vmul.f32 -1.442695, %v561_v32  ;;  %v137_v21 = vadd.f32 %v2851_v4, %v96_v57  ;;  %v3781_v57 = vld [vmem:[#allocation13_spill] sm:$0xff] }
 0x1e8   :  { %2269 = vpow2.f32 %v1754_v31 }
 0x1f3   :  { %v2268_v55 = vpop.eup %2267 }
 0x1f4   :  { %v568_v50 = vadd.f32 1.0, %v2268_v55 }
 0x1f5   :  { %v2270_v61 = vpop.eup %2269 }
 0x1f6   :  { %2271 = vrcp.f32 %v568_v50  ;;  %v569_v3 = vadd.f32 1.0, %v2270_v61  ;;  %v3776_v50 = vld [vmem:[#allocation5_spill] sm:$0xff] }
 0x1f7   :  { %v3782_v61 = vld [vmem:[#allocation9_spill] sm:$0xff] }
 0x203   :  { %v2272_v0 = vpop.eup %2271 }
 0x204   :  { %v574_v58 = vmul.f32 %v2272_v0, %v557_v24  ;;  %v3783_v24 = vld [vmem:[#allocation10_spill] sm:$0xff] }
 0x205   :  { %v3784_v0 = vld [vmem:[#allocation14_spill] sm:$0xff] }
 0x206   :  { %v575_v63 = vadd.f32 %v574_v58, %v137_v21  ;;  %v3785_v21 = vld [vmem:[#allocation4_spill] sm:$0xff]  ;;  %v48_v58 = vpop.permute.xlu1 %47 }
 0x208   :  { %2273 = vtanh.f32 %v575_v63  ;;  %v3786_v63 = vld [vmem:[#allocation15_spill] sm:$0xff] }
 0x209   :  { %2275 = vrcp.f32 %v569_v3  ;;  %v3775_v3 = vld [vmem:[#allocation11_spill] sm:$0xff] }
 0x215   :  { %v2274_v60 = vpop.eup %2273 }
 0x216   :  { %v577_v32 = vsub.f32 %v2856_v59, %v2274_v60  ;;  %v2276_v51 = vpop.eup %2275 }
 0x218   :  { %v578_v55 = vmul.f32 %v2276_v51, %v577_v32 }
 0x21a   :  { %v2949_v31 = vadd.f32 %v2274_v60, %v578_v55  ;;  %v97_v60 = vmul.f32 %v3786_v63, %v48_v58 }
 0x21c   :  { %3774 = vst [vmem:[#allocation16_spill] sm:$0xff] %v2949_v31  ;;  %653 = vmatmul.mubr.f32.vlgmr.msra.gmra.mxu0 %v2949_v31  ;;  %2031 = vmatmul.mubr.f32.vlgmr.msra.gmra.mxu1 %v2949_v31  ;;  %v138_v32 = vadd.f32 %v3771_v56, %v97_v60  ;;  %v99_v60 = vmul.f32 %v2847_v34, %v48_v58 }
 0x21d   :  { %758 = vmatpush1.msra.mxu0 %v2436_v1  ;;  %2034 = vmatpush3.msra.mxu1 %v2661_v38 }
 0x21e   :  { %759 = vmatprep.subr.mxu0 %v2441_v2  ;;  %2035 = vmatprep.subr.mxu1 %v3763_v53 }
 0x21f   :  { %760 = vmatpush1.msra.mxu0 %v2449_v5  ;;  %2036 = vmatpush3.msra.mxu1 %v2671_v39 }
 0x220   :  { %761 = vmatprep.subr.mxu0 %v2456_v6  ;;  %2037 = vmatprep.subr.mxu1 %v3763_v53 }
 0x221   :  { %762 = vmatpush1.msra.mxu0 %v2463_v7  ;;  %2038 = vmatpush3.msra.mxu1 %v2680_v40 }
 0x222   :  { %763 = vmatprep.subr.mxu0 %v2470_v8  ;;  %2039 = vmatprep.subr.mxu1 %v3763_v53 }
 0x223   :  { %764 = vmatpush1.msra.mxu0 %v2477_v9  ;;  %2040 = vmatpush3.msra.mxu1 %v2689_v41 }
 0x224   :  { %765 = vmatprep.subr.mxu0 %v2484_v10  ;;  %2041 = vmatprep.subr.mxu1 %v3763_v53 }
 0x225   :  { %766 = vmatpush1.msra.mxu0 %v2491_v11  ;;  %2042 = vmatpush3.msra.mxu1 %v2698_v42 }
 0x226   :  { %767 = vmatprep.subr.mxu0 %v2498_v12  ;;  %2043 = vmatprep.subr.mxu1 %v3763_v53 }
 0x227   :  { %768 = vmatpush1.msra.mxu0 %v2505_v13  ;;  %2044 = vmatpush3.msra.mxu1 %v2707_v43 }
 0x228   :  { %769 = vmatprep.subr.mxu0 %v2512_v14  ;;  %2045 = vmatprep.subr.mxu1 %v3763_v53 }
 0x229   :  { %770 = vmatpush1.msra.mxu0 %v2519_v15  ;;  %2046 = vmatpush3.msra.mxu1 %v2716_v44 }
 0x22a   :  { %771 = vmatprep.subr.mxu0 %v2526_v16  ;;  %2047 = vmatprep.subr.mxu1 %v3763_v53 }
 0x22b   :  { %772 = vmatpush1.msra.mxu0 %v2533_v17  ;;  %2048 = vmatpush3.msra.mxu1 %v2723_v45 }
 0x22c   :  { %773 = vmatprep.subr.mxu0 %v2540_v18  ;;  %2049 = vmatprep.subr.mxu1 %v3763_v53 }
 0x22d   :  { %774 = vmatpush1.msra.mxu0 %v2547_v19  ;;  %2050 = vmatpush3.msra.mxu1 %v2730_v46 }
 0x22e   :  { %775 = vmatprep.subr.mxu0 %v2554_v20  ;;  %2051 = vmatprep.subr.mxu1 %v3763_v53 }
 0x22f   :  { %776 = vmatpush1.msra.mxu0 %v2564_v22  ;;  %2052 = vmatpush3.msra.mxu1 %v2737_v47 }
 0x230   :  { %777 = vmatprep.subr.mxu0 %v2570_v23  ;;  %2053 = vmatprep.subr.mxu1 %v3763_v53 }
 0x231   :  { %778 = vmatpush1.msra.mxu0 %v2579_v25  ;;  %2054 = vmatpush3.msra.mxu1 %v2744_v48 }
 0x232   :  { %779 = vmatprep.subr.mxu0 %v2586_v26  ;;  %2055 = vmatprep.subr.mxu1 %v3763_v53 }
 0x233   :  { %780 = vmatpush1.msra.mxu0 %v2593_v27  ;;  %2056 = vmatpush3.msra.mxu1 %v2751_v49 }
 0x234   :  { %781 = vmatprep.subr.mxu0 %v2599_v28  ;;  %2057 = vmatprep.subr.mxu1 %v3763_v53 }
 0x235   :  { %782 = vmatpush1.msra.mxu0 %v2609_v30  ;;  %2058 = vmatpush3.msra.mxu1 %v3775_v3 }
 0x236   :  { %783 = vmatprep.subr.mxu0 %v3776_v50  ;;  %2059 = vmatprep.subr.mxu1 %v3763_v53 }
 0x237   :  { %784 = vmatpush1.msra.mxu0 %v3777_v62  ;;  %2060 = vmatpush3.msra.mxu1 %v3778_v29 }
 0x238   :  { %785 = vmatprep.subr.mxu0 %v3779_v35  ;;  %2061 = vmatprep.subr.mxu1 %v3763_v53 }
 0x239   :  { %786 = vmatpush1.msra.mxu0 %v3780_v52  ;;  %2062 = vmatpush3.msra.mxu1 %v3781_v57  ;;  %v3787_v52 = vld [vmem:[#allocation18_spill] sm:$0xff] }
 0x23a   :  { %787 = vmatprep.subr.mxu0 %v3782_v61  ;;  %2063 = vmatprep.subr.mxu1 %v3763_v53  ;;  %v98_v35 = vmul.f32 %v3787_v52, %v48_v58 }
 0x23b   :  { %788 = vmatpush1.msra.mxu0 %v3783_v24  ;;  %821 = vmatprep.mubr.f32.mxu0 %v3763_v53 }
 0x23c   :  { %2064 = vmatpush3.msra.mxu1 %v3784_v0  ;;  %2065 = vmatprep.mubr.msk.f32.mxu1 %vm2387_vm0, %v3763_v53  ;;  %v139_v29 = vadd.f32 %v2843_v36, %v98_v35 }
 0x23d   :  { %926 = vmatprep.subr.mxu0 %v3785_v21  ;;  %2068 = vmatprep.subr.mxu1 %v3763_v53 }
 0x2dc   :  { %v654_v51 = vpop.f32.mrf.mxu0  ;;  %v725_v55 = vpop.f32.mrf.mxu1 }
 0x2dd   :  { %v655_v59 = vadd.f32 %v654_v51, %v3772_v37 }
 0x2de   :  { %v2032_v24 = vpop.f32.mrf.mxu1  ;;  %v656_v0 = vpop.f32.mrf.mxu0 }
 0x2df   :  { %v729_v61 = vadd.f32 %v655_v59, %v138_v32  ;;  %v657_v21 = vadd.f32 %v656_v0, %v3773_v33  ;;  %v726_v59 = vadd.f32 %v725_v55, %v2849_v54 }
 0x2e1   :  { %v1755_v57 = vmul.f32 -1.442695, %v729_v61  ;;  %v730_v62 = vadd.f32 %v657_v21, %v139_v29 }
 0x2e3   :  { %2277 = vpow2.f32 %v1755_v57  ;;  %v1756_v50 = vmul.f32 -1.442695, %v730_v62  ;;  %v140_v57 = vadd.f32 %v2851_v4, %v99_v60 }
 0x2e5   :  { %2279 = vpow2.f32 %v1756_v50 }
 0x2f0   :  { %v2278_v63 = vpop.eup %2277 }
 0x2f1   :  { %v737_v3 = vadd.f32 1.0, %v2278_v63 }
 0x2f2   :  { %v2280_v51 = vpop.eup %2279 }
 0x2f3   :  { %2281 = vrcp.f32 %v737_v3  ;;  %v738_v52 = vadd.f32 1.0, %v2280_v51 }
 0x300   :  { %v2282_v61 = vpop.eup %2281 }
 0x301   :  { %v743_v24 = vmul.f32 %v2282_v61, %v726_v59 }
 0x303   :  { %v744_v32 = vadd.f32 %v743_v24, %v140_v57 }
 0x305   :  { %2283 = vtanh.f32 %v744_v32 }
 0x306   :  { %2285 = vrcp.f32 %v738_v52 }
 0x312   :  { %v2284_v35 = vpop.eup %2283 }
 0x313   :  { %v746_v62 = vsub.f32 %v2949_v31, %v2284_v35  ;;  %v2286_v29 = vpop.eup %2285 }
 0x315   :  { %v747_v0 = vmul.f32 %v2286_v29, %v746_v62 }
 0x317   :  { %v3030_v50 = vadd.f32 %v2284_v35, %v747_v0 }
 0x319   :  { %3788 = vst [vmem:[#allocation17_spill] sm:$0xff] %v3030_v50  ;;  %822 = vmatmul.mubr.f32.vlgmr.msra.gmra.mxu0 %v3030_v50  ;;  %2066 = vmatmul.mubr.f32.vlgmr.msra.gmra.mxu1 %v3030_v50 }
 0x31a   :  { %927 = vmatpush1.msra.mxu0 %v2436_v1  ;;  %2069 = vmatpush3.msra.mxu1 %v2661_v38  ;;  %v3789_v1 = vld [vmem:[#allocation11_spill] sm:$0xff] }
 0x31b   :  { %928 = vmatprep.subr.mxu0 %v2441_v2  ;;  %2070 = vmatprep.subr.mxu1 %v3763_v53  ;;  %v3790_v2 = vld [vmem:[#allocation5_spill] sm:$0xff] }
 0x31c   :  { %929 = vmatpush1.msra.mxu0 %v2449_v5  ;;  %2071 = vmatpush3.msra.mxu1 %v2671_v39  ;;  %v3791_v5 = vld [vmem:[#allocation6_spill] sm:$0xff] }
 0x31d   :  { %930 = vmatprep.subr.mxu0 %v2456_v6  ;;  %2072 = vmatprep.subr.mxu1 %v3763_v53  ;;  %v3792_v6 = vld [vmem:[#allocation12_spill] sm:$0xff] }
 0x31e   :  { %931 = vmatpush1.msra.mxu0 %v2463_v7  ;;  %2073 = vmatpush3.msra.mxu1 %v2680_v40  ;;  %v3793_v7 = vld [vmem:[#allocation7_spill] sm:$0xff] }
 0x31f   :  { %932 = vmatprep.subr.mxu0 %v2470_v8  ;;  %2074 = vmatprep.subr.mxu1 %v3763_v53  ;;  %v3794_v8 = vld [vmem:[#allocation8_spill] sm:$0xff] }
 0x320   :  { %933 = vmatpush1.msra.mxu0 %v2477_v9  ;;  %2075 = vmatpush3.msra.mxu1 %v2689_v41  ;;  %v3795_v9 = vld [vmem:[#allocation13_spill] sm:$0xff] }
 0x321   :  { %934 = vmatprep.subr.mxu0 %v2484_v10  ;;  %2076 = vmatprep.subr.mxu1 %v3763_v53  ;;  %v3796_v10 = vld [vmem:[#allocation9_spill] sm:$0xff] }
 0x322   :  { %935 = vmatpush1.msra.mxu0 %v2491_v11  ;;  %2077 = vmatpush3.msra.mxu1 %v2698_v42  ;;  %v3797_v11 = vld [vmem:[#allocation10_spill] sm:$0xff] }
 0x323   :  { %936 = vmatprep.subr.mxu0 %v2498_v12  ;;  %2078 = vmatprep.subr.mxu1 %v3763_v53  ;;  %v3798_v12 = vld [vmem:[#allocation14_spill] sm:$0xff] }
 0x324   :  { %937 = vmatpush1.msra.mxu0 %v2505_v13  ;;  %2079 = vmatpush3.msra.mxu1 %v2707_v43  ;;  %v3102_v13 = vld [vmem:[%s3688_s2 + $0x170] sm:$0xff] }
 0x325   :  { %938 = vmatprep.subr.mxu0 %v2512_v14  ;;  %2080 = vmatprep.subr.mxu1 %v3763_v53  ;;  %v53_v14 = vpop.permute.xlu1 %52 }
 0x326   :  { %939 = vmatpush1.msra.mxu0 %v2519_v15  ;;  %2081 = vmatpush3.msra.mxu1 %v2716_v44  ;;  %v3799_v15 = vld [vmem:[#allocation15_spill] sm:$0xff]  ;;  %v102_v21 = vmul.f32 %v2847_v34, %v53_v14 }
 0x327   :  { %940 = vmatprep.subr.mxu0 %v2526_v16  ;;  %2082 = vmatprep.subr.mxu1 %v3763_v53  ;;  %v100_v16 = vmul.f32 %v3799_v15, %v53_v14 }
 0x328   :  { %941 = vmatpush1.msra.mxu0 %v2533_v17  ;;  %2083 = vmatpush3.msra.mxu1 %v2723_v45  ;;  %v143_v61 = vadd.f32 %v2851_v4, %v102_v21 }
 0x329   :  { %942 = vmatprep.subr.mxu0 %v2540_v18  ;;  %2084 = vmatprep.subr.mxu1 %v3763_v53 }
 0x32a   :  { %943 = vmatpush1.msra.mxu0 %v2547_v19  ;;  %2085 = vmatpush3.msra.mxu1 %v2730_v46  ;;  %v141_v19 = vadd.f32 %v3771_v56, %v100_v16  ;;  %v3193_v16 = vld [vmem:[%s3688_s2 + $0xf0] sm:$0xff] }
 0x32b   :  { %944 = vmatprep.subr.mxu0 %v2554_v20  ;;  %2086 = vmatprep.subr.mxu1 %v3763_v53 }
 0x32c   :  { %945 = vmatpush1.msra.mxu0 %v2564_v22  ;;  %2087 = vmatpush3.msra.mxu1 %v2737_v47 }
 0x32d   :  { %946 = vmatprep.subr.mxu0 %v2570_v23  ;;  %2088 = vmatprep.subr.mxu1 %v3763_v53 }
 0x32e   :  { %947 = vmatpush1.msra.mxu0 %v2579_v25  ;;  %2089 = vmatpush3.msra.mxu1 %v2744_v48 }
 0x32f   :  { %948 = vmatprep.subr.mxu0 %v2586_v26  ;;  %2090 = vmatprep.subr.mxu1 %v3763_v53 }
 0x330   :  { %949 = vmatpush1.msra.mxu0 %v2593_v27  ;;  %2091 = vmatpush3.msra.mxu1 %v2751_v49  ;;  %v3800_v27 = vld [vmem:[#allocation18_spill] sm:$0xff] }
 0x331   :  { %950 = vmatprep.subr.mxu0 %v2599_v28  ;;  %2092 = vmatprep.subr.mxu1 %v3763_v53  ;;  %v101_v28 = vmul.f32 %v3800_v27, %v53_v14  ;;  %v3179_v14 = vld [vmem:[%s3688_s2 + $0x108] sm:$0xff] }
 0x332   :  { %951 = vmatpush1.msra.mxu0 %v2609_v30  ;;  %2093 = vmatpush3.msra.mxu1 %v3789_v1 }
 0x333   :  { %952 = vmatprep.subr.mxu0 %v3790_v2  ;;  %2094 = vmatprep.subr.mxu1 %v3763_v53  ;;  %v142_v3 = vadd.f32 %v2843_v36, %v101_v28  ;;  %v3319_v28 = vld [vmem:[%s3688_s2 + $0x18] sm:$0xff] }
 0x334   :  { %953 = vmatpush1.msra.mxu0 %v3791_v5  ;;  %2095 = vmatpush3.msra.mxu1 %v3792_v6  ;;  %v3123_v5 = vld [vmem:[%s3688_s2 + $0x168] sm:$0xff]  ;;  %3805 = vst [vmem:[#allocation6_spill] sm:$0xff] %v3319_v28 }
 0x335   :  { %954 = vmatprep.subr.mxu0 %v3793_v7  ;;  %2096 = vmatprep.subr.mxu1 %v3763_v53  ;;  %v3130_v7 = vld [vmem:[%s3688_s2 + $0x158] sm:$0xff] }
 0x336   :  { %955 = vmatpush1.msra.mxu0 %v3794_v8  ;;  %2097 = vmatpush3.msra.mxu1 %v3795_v9  ;;  %v3137_v8 = vld [vmem:[%s3688_s2 + $0x150] sm:$0xff] }
 0x337   :  { %956 = vmatprep.subr.mxu0 %v3796_v10  ;;  %2098 = vmatprep.subr.mxu1 %v3763_v53  ;;  %v3151_v10 = vld [vmem:[%s3688_s2 + $0x138] sm:$0xff] }
 0x338   :  { %957 = vmatpush1.msra.mxu0 %v3797_v11  ;;  %990 = vmatprep.mubr.f32.mxu0 %v3763_v53  ;;  %v3165_v11 = vld [vmem:[%s3688_s2 + $0x120] sm:$0xff] }
 0x339   :  { %2099 = vmatpush3.msra.mxu1 %v3798_v12  ;;  %2100 = vmatprep.mubr.msk.f32.mxu1 %vm2387_vm0, %v3763_v53 }
 0x33a   :  { %1095 = vmatprep.subr.mxu0 %v3102_v13  ;;  %2103 = vmatprep.subr.mxu1 %v3763_v53 }
 0x3d9   :  { %v823_v17 = vpop.f32.mrf.mxu0  ;;  %v894_v18 = vpop.f32.mrf.mxu1 }
 0x3da   :  { %v824_v20 = vadd.f32 %v823_v17, %v3772_v37  ;;  %v895_v51 = vadd.f32 %v894_v18, %v2849_v54  ;;  %v3207_v17 = vld [vmem:[%s3688_s2 + $0xd8] sm:$0xff]  ;;  %v3221_v18 = vld [vmem:[%s3688_s2 + $0xc0] sm:$0xff] }
 0x3db   :  { %v2067_v22 = vpop.f32.mrf.mxu1  ;;  %v825_v26 = vpop.f32.mrf.mxu0 }
 0x3dc   :  { %v898_v23 = vadd.f32 %v824_v20, %v141_v19  ;;  %v826_v30 = vadd.f32 %v825_v26, %v3773_v33  ;;  %v3235_v19 = vld [vmem:[%s3688_s2 + $0xa8] sm:$0xff]  ;;  %v3249_v20 = vld [vmem:[%s3688_s2 + $0x90] sm:$0xff]  ;;  %v3263_v22 = vld [vmem:[%s3688_s2 + $0x78] sm:$0xff] }
 0x3dd   :  { %v3305_v26 = vld [vmem:[%s3688_s2 + $0x30] sm:$0xff] }
 0x3de   :  { %v1757_v25 = vmul.f32 -1.442695, %v898_v23  ;;  %v899_v52 = vadd.f32 %v826_v30, %v142_v3  ;;  %v3277_v23 = vld [vmem:[%s3688_s2 + $0x60] sm:$0xff]  ;;  %3803 = vst [vmem:[#allocation11_spill] sm:$0xff] %v3305_v26 }
 0x3df   :  { %v3333_v30 = vld [vmem:[%s3688_s2] sm:$0xff] }
 0x3e0   :  { %2287 = vpow2.f32 %v1757_v25  ;;  %v1758_v58 = vmul.f32 -1.442695, %v899_v52  ;;  %v3291_v25 = vld [vmem:[%s3688_s2 + $0x48] sm:$0xff]  ;;  %3807 = vst [vmem:[#allocation7_spill] sm:$0xff] %v3333_v30 }
 0x3e2   :  { %2289 = vpow2.f32 %v1758_v58 }
 0x3ed   :  { %v2288_v63 = vpop.eup %2287 }
 0x3ee   :  { %v906_v55 = vadd.f32 1.0, %v2288_v63 }
 0x3ef   :  { %v2290_v60 = vpop.eup %2289 }
 0x3f0   :  { %2291 = vrcp.f32 %v906_v55  ;;  %v907_v32 = vadd.f32 1.0, %v2290_v60 }
 0x3fd   :  { %v2292_v59 = vpop.eup %2291 }
 0x3fe   :  { %v912_v57 = vmul.f32 %v2292_v59, %v895_v51 }
 0x400   :  { %v913_v24 = vadd.f32 %v912_v57, %v143_v61 }
 0x402   :  { %2293 = vtanh.f32 %v913_v24 }
 0x403   :  { %2295 = vrcp.f32 %v907_v32 }
 0x40f   :  { %v2294_v35 = vpop.eup %2293 }
 0x410   :  { %v915_v62 = vsub.f32 %v3030_v50, %v2294_v35  ;;  %v2296_v29 = vpop.eup %2295 }
 0x412   :  { %v916_v0 = vmul.f32 %v2296_v29, %v915_v62 }
 0x414   :  { %v3116_v2 = vadd.f32 %v2294_v35, %v916_v0 }
 0x416   :  { %3801 = vst [vmem:[#allocation19_spill] sm:$0xff] %v3116_v2  ;;  %991 = vmatmul.mubr.f32.vlgmr.msra.gmra.mxu0 %v3116_v2  ;;  %2101 = vmatmul.mubr.f32.vlgmr.msra.gmra.mxu1 %v3116_v2 }
 0x417   :  { %1096 = vmatpush1.msra.mxu0 %v3123_v5  ;;  %2104 = vmatpush3.msra.mxu1 %v2661_v38  ;;  %v3144_v38 = vld [vmem:[%s3688_s2 + $0x140] sm:$0xff] }
 0x418   :  { %1097 = vmatprep.subr.mxu0 %v3130_v7  ;;  %2105 = vmatprep.subr.mxu1 %v3763_v53 }
 0x419   :  { %1098 = vmatpush1.msra.mxu0 %v3137_v8  ;;  %2106 = vmatpush3.msra.mxu1 %v2671_v39  ;;  %v3158_v39 = vld [vmem:[%s3688_s2 + $0x128] sm:$0xff] }
 0x41a   :  { %1099 = vmatprep.subr.mxu0 %v3144_v38  ;;  %2107 = vmatprep.subr.mxu1 %v3763_v53 }
 0x41b   :  { %1100 = vmatpush1.msra.mxu0 %v3151_v10  ;;  %2108 = vmatpush3.msra.mxu1 %v2680_v40  ;;  %v3172_v40 = vld [vmem:[%s3688_s2 + $0x110] sm:$0xff] }
 0x41c   :  { %1101 = vmatprep.subr.mxu0 %v3158_v39  ;;  %2109 = vmatprep.subr.mxu1 %v3763_v53 }
 0x41d   :  { %1102 = vmatpush1.msra.mxu0 %v3165_v11  ;;  %2110 = vmatpush3.msra.mxu1 %v2689_v41  ;;  %v3186_v41 = vld [vmem:[%s3688_s2 + $0xf8] sm:$0xff] }
 0x41e   :  { %1103 = vmatprep.subr.mxu0 %v3172_v40  ;;  %2111 = vmatprep.subr.mxu1 %v3763_v53 }
 0x41f   :  { %1104 = vmatpush1.msra.mxu0 %v3179_v14  ;;  %2112 = vmatpush3.msra.mxu1 %v2698_v42  ;;  %v3200_v42 = vld [vmem:[%s3688_s2 + $0xe0] sm:$0xff] }
 0x420   :  { %1105 = vmatprep.subr.mxu0 %v3186_v41  ;;  %2113 = vmatprep.subr.mxu1 %v3763_v53 }
 0x421   :  { %1106 = vmatpush1.msra.mxu0 %v3193_v16  ;;  %2114 = vmatpush3.msra.mxu1 %v2707_v43  ;;  %v3214_v43 = vld [vmem:[%s3688_s2 + $0xc8] sm:$0xff] }
 0x422   :  { %1107 = vmatprep.subr.mxu0 %v3200_v42  ;;  %2115 = vmatprep.subr.mxu1 %v3763_v53 }
 0x423   :  { %1108 = vmatpush1.msra.mxu0 %v3207_v17  ;;  %2116 = vmatpush3.msra.mxu1 %v2716_v44  ;;  %v3228_v44 = vld [vmem:[%s3688_s2 + $0xb0] sm:$0xff] }
 0x424   :  { %1109 = vmatprep.subr.mxu0 %v3214_v43  ;;  %2117 = vmatprep.subr.mxu1 %v3763_v53 }
 0x425   :  { %1110 = vmatpush1.msra.mxu0 %v3221_v18  ;;  %2118 = vmatpush3.msra.mxu1 %v2723_v45  ;;  %v3242_v45 = vld [vmem:[%s3688_s2 + $0x98] sm:$0xff] }
 0x426   :  { %1111 = vmatprep.subr.mxu0 %v3228_v44  ;;  %2119 = vmatprep.subr.mxu1 %v3763_v53 }
 0x427   :  { %1112 = vmatpush1.msra.mxu0 %v3235_v19  ;;  %2120 = vmatpush3.msra.mxu1 %v2730_v46  ;;  %v3256_v46 = vld [vmem:[%s3688_s2 + $0x80] sm:$0xff] }
 0x428   :  { %1113 = vmatprep.subr.mxu0 %v3242_v45  ;;  %2121 = vmatprep.subr.mxu1 %v3763_v53 }
 0x429   :  { %1114 = vmatpush1.msra.mxu0 %v3249_v20  ;;  %2122 = vmatpush3.msra.mxu1 %v2737_v47  ;;  %v3270_v47 = vld [vmem:[%s3688_s2 + $0x68] sm:$0xff] }
 0x42a   :  { %1115 = vmatprep.subr.mxu0 %v3256_v46  ;;  %2123 = vmatprep.subr.mxu1 %v3763_v53 }
 0x42b   :  { %1116 = vmatpush1.msra.mxu0 %v3263_v22  ;;  %2124 = vmatpush3.msra.mxu1 %v2744_v48  ;;  %v3284_v48 = vld [vmem:[%s3688_s2 + $0x50] sm:$0xff] }
 0x42c   :  { %1117 = vmatprep.subr.mxu0 %v3270_v47  ;;  %2125 = vmatprep.subr.mxu1 %v3763_v53 }
 0x42d   :  { %1118 = vmatpush1.msra.mxu0 %v3277_v23  ;;  %2126 = vmatpush3.msra.mxu1 %v2751_v49  ;;  %v3298_v49 = vld [vmem:[%s3688_s2 + $0x38] sm:$0xff] }
 0x42e   :  { %1119 = vmatprep.subr.mxu0 %v3284_v48  ;;  %2127 = vmatprep.subr.mxu1 %v3763_v53  ;;  %3802 = vst [vmem:[#allocation4_spill] sm:$0xff] %v3298_v49 }
 0x42f   :  { %1120 = vmatpush1.msra.mxu0 %v3291_v25  ;;  %2128 = vmatpush3.msra.mxu1 %v3789_v1  ;;  %v3312_v1 = vld [vmem:[%s3688_s2 + $0x20] sm:$0xff] }
 0x430   :  { %1121 = vmatprep.subr.mxu0 %v3298_v49  ;;  %2129 = vmatprep.subr.mxu1 %v3763_v53  ;;  %3804 = vst [vmem:[#allocation5_spill] sm:$0xff] %v3312_v1 }
 0x431   :  { %1122 = vmatpush1.msra.mxu0 %v3305_v26  ;;  %2130 = vmatpush3.msra.mxu1 %v3792_v6  ;;  %v3326_v6 = vld [vmem:[%s3688_s2 + $0x8] sm:$0xff] }
 0x432   :  { %1123 = vmatprep.subr.mxu0 %v3312_v1  ;;  %2131 = vmatprep.subr.mxu1 %v3763_v53  ;;  %3806 = vst [vmem:[#allocation12_spill] sm:$0xff] %v3326_v6 }
 0x433   :  { %1124 = vmatpush1.msra.mxu0 %v3319_v28  ;;  %2132 = vmatpush3.msra.mxu1 %v3795_v9  ;;  %v58_v9 = vpop.permute.xlu0 %57 }
 0x434   :  { %1125 = vmatprep.subr.mxu0 %v3326_v6  ;;  %2133 = vmatprep.subr.mxu1 %v3763_v53  ;;  %v103_v3 = vmul.f32 %v3799_v15, %v58_v9  ;;  %v104_v59 = vmul.f32 %v3800_v27, %v58_v9  ;;  %v105_v29 = vmul.f32 %v2847_v34, %v58_v9  ;;  %v3360_v9 = vld [vmem:[%s3688_s2 + $0x178] sm:$0xff] }
 0x435   :  { %1126 = vmatpush1.msra.mxu0 %v3333_v30  ;;  %1159 = vmatprep.mubr.f32.mxu0 %v3763_v53 }
 0x436   :  { %2134 = vmatpush3.msra.mxu1 %v3798_v12  ;;  %2135 = vmatprep.mubr.msk.f32.mxu1 %vm2387_vm0, %v3763_v53  ;;  %v144_v63 = vadd.f32 %v3771_v56, %v103_v3  ;;  %v145_v57 = vadd.f32 %v2843_v36, %v104_v59 }
 0x437   :  { %1264 = vmatprep.subr.mxu0 %v3102_v13  ;;  %2138 = vmatprep.subr.mxu1 %v3763_v53 }
 0x4d6   :  { %v992_v52 = vpop.f32.mrf.mxu0  ;;  %v1063_v58 = vpop.f32.mrf.mxu1 }
 0x4d7   :  { %v993_v55 = vadd.f32 %v992_v52, %v3772_v37  ;;  %v1064_v3 = vadd.f32 %v1063_v58, %v2849_v54  ;;  %v3369_v58 = vld [vmem:[%s3688_s2 + $0x160] sm:$0xff] }
 0x4d8   :  { %v2102_v21 = vpop.f32.mrf.mxu1  ;;  %v994_v12 = vpop.f32.mrf.mxu0 }
 0x4d9   :  { %v1067_v60 = vadd.f32 %v993_v55, %v144_v63  ;;  %v995_v61 = vadd.f32 %v994_v12, %v3773_v33  ;;  %v146_v63 = vadd.f32 %v2851_v4, %v105_v29  ;;  %v3414_v29 = vld [vmem:[%s3688_s2 + $0xe8] sm:$0xff] }
 0x4db   :  { %v1759_v51 = vmul.f32 -1.442695, %v1067_v60  ;;  %v1068_v24 = vadd.f32 %v995_v61, %v145_v57 }
 0x4dd   :  { %2297 = vpow2.f32 %v1759_v51  ;;  %v1760_v32 = vmul.f32 -1.442695, %v1068_v24  ;;  %v3378_v24 = vld [vmem:[%s3688_s2 + $0x148] sm:$0xff] }
 0x4df   :  { %2299 = vpow2.f32 %v1760_v32  ;;  %v3387_v32 = vld [vmem:[%s3688_s2 + $0x130] sm:$0xff] }
 0x4ea   :  { %v2298_v35 = vpop.eup %2297 }
 0x4eb   :  { %v1075_v62 = vadd.f32 1.0, %v2298_v35  ;;  %v3396_v35 = vld [vmem:[%s3688_s2 + $0x118] sm:$0xff] }
 0x4ec   :  { %v2300_v0 = vpop.eup %2299 }
 0x4ed   :  { %2301 = vrcp.f32 %v1075_v62  ;;  %v1076_v60 = vadd.f32 1.0, %v2300_v0  ;;  %v3405_v62 = vld [vmem:[%s3688_s2 + $0x100] sm:$0xff]  ;;  %v3423_v0 = vld [vmem:[%s3688_s2 + $0xd0] sm:$0xff] }
 0x4fa   :  { %v2302_v52 = vpop.eup %2301 }
 0x4fb   :  { %v1081_v55 = vmul.f32 %v2302_v52, %v1064_v3  ;;  %v3432_v3 = vld [vmem:[%s3688_s2 + $0xb8] sm:$0xff]  ;;  %v3441_v52 = vld [vmem:[%s3688_s2 + $0xa0] sm:$0xff] }
 0x4fd   :  { %v1082_v21 = vadd.f32 %v1081_v55, %v146_v63  ;;  %v3450_v63 = vld [vmem:[%s3688_s2 + $0x88] sm:$0xff]  ;;  %v3459_v55 = vld [vmem:[%s3688_s2 + $0x70] sm:$0xff] }
 0x4ff   :  { %2303 = vtanh.f32 %v1082_v21  ;;  %v3468_v21 = vld [vmem:[%s3688_s2 + $0x58] sm:$0xff] }
 0x500   :  { %2305 = vrcp.f32 %v1076_v60  ;;  %3808 = vst [vmem:[#allocation8_spill] sm:$0xff] %v3468_v21  ;;  %v3477_v60 = vld [vmem:[%s3688_s2 + $0x40] sm:$0xff] }
 0x501   :  { %3809 = vst [vmem:[#allocation13_spill] sm:$0xff] %v3477_v60 }
 0x50c   :  { %v2304_v51 = vpop.eup %2303 }
 0x50d   :  { %v1084_v12 = vsub.f32 %v3116_v2, %v2304_v51  ;;  %v2306_v59 = vpop.eup %2305 }
 0x50f   :  { %v1085_v61 = vmul.f32 %v2306_v59, %v1084_v12  ;;  %v3496_v12 = vld [vmem:[%s3688_s2 + $0x10] sm:$0xff]  ;;  %v63_v59 = vpop.permute.xlu1 %62 }
 0x510   :  { %3811 = vst [vmem:[#allocation10_spill] sm:$0xff] %v3496_v12 }
 0x511   :  { %v3352_v57 = vadd.f32 %v2304_v51, %v1085_v61  ;;  %v3486_v51 = vld [vmem:[%s3688_s2 + $0x28] sm:$0xff]  ;;  %v106_v61 = vmul.f32 %v3799_v15, %v63_v59 }
 0x512   :  { %3810 = vst [vmem:[#allocation9_spill] sm:$0xff] %v3486_v51 }
 0x513   :  { %1160 = vmatmul.mubr.f32.vlgmr.msra.gmra.mxu0 %v3352_v57  ;;  %2136 = vmatmul.mubr.f32.vlgmr.msra.gmra.mxu1 %v3352_v57  ;;  %v147_v31 = vadd.f32 %v3771_v56, %v106_v61  ;;  %v108_v61 = vmul.f32 %v2847_v34, %v63_v59 }
 0x514   :  { %1265 = vmatpush1.msra.mxu0 %v3123_v5  ;;  %2139 = vmatpush3.msra.mxu1 %v3360_v9 }
 0x515   :  { %1266 = vmatprep.subr.mxu0 %v3130_v7  ;;  %2140 = vmatprep.subr.mxu1 %v3763_v53 }
 0x516   :  { %1267 = vmatpush1.msra.mxu0 %v3137_v8  ;;  %2141 = vmatpush3.msra.mxu1 %v3369_v58 }
 0x517   :  { %1268 = vmatprep.subr.mxu0 %v3144_v38  ;;  %2142 = vmatprep.subr.mxu1 %v3763_v53 }
 0x518   :  { %1269 = vmatpush1.msra.mxu0 %v3151_v10  ;;  %2143 = vmatpush3.msra.mxu1 %v3378_v24 }
 0x519   :  { %1270 = vmatprep.subr.mxu0 %v3158_v39  ;;  %2144 = vmatprep.subr.mxu1 %v3763_v53 }
 0x51a   :  { %1271 = vmatpush1.msra.mxu0 %v3165_v11  ;;  %2145 = vmatpush3.msra.mxu1 %v3387_v32 }
 0x51b   :  { %1272 = vmatprep.subr.mxu0 %v3172_v40  ;;  %2146 = vmatprep.subr.mxu1 %v3763_v53 }
 0x51c   :  { %1273 = vmatpush1.msra.mxu0 %v3179_v14  ;;  %2147 = vmatpush3.msra.mxu1 %v3396_v35 }
 0x51d   :  { %1274 = vmatprep.subr.mxu0 %v3186_v41  ;;  %2148 = vmatprep.subr.mxu1 %v3763_v53 }
 0x51e   :  { %1275 = vmatpush1.msra.mxu0 %v3193_v16  ;;  %2149 = vmatpush3.msra.mxu1 %v3405_v62 }
 0x51f   :  { %1276 = vmatprep.subr.mxu0 %v3200_v42  ;;  %2150 = vmatprep.subr.mxu1 %v3763_v53 }
 0x520   :  { %1277 = vmatpush1.msra.mxu0 %v3207_v17  ;;  %2151 = vmatpush3.msra.mxu1 %v3414_v29 }
 0x521   :  { %1278 = vmatprep.subr.mxu0 %v3214_v43  ;;  %2152 = vmatprep.subr.mxu1 %v3763_v53 }
 0x522   :  { %1279 = vmatpush1.msra.mxu0 %v3221_v18  ;;  %2153 = vmatpush3.msra.mxu1 %v3423_v0 }
 0x523   :  { %1280 = vmatprep.subr.mxu0 %v3228_v44  ;;  %2154 = vmatprep.subr.mxu1 %v3763_v53 }
 0x524   :  { %1281 = vmatpush1.msra.mxu0 %v3235_v19  ;;  %2155 = vmatpush3.msra.mxu1 %v3432_v3 }
 0x525   :  { %1282 = vmatprep.subr.mxu0 %v3242_v45  ;;  %2156 = vmatprep.subr.mxu1 %v3763_v53 }
 0x526   :  { %1283 = vmatpush1.msra.mxu0 %v3249_v20  ;;  %2157 = vmatpush3.msra.mxu1 %v3441_v52 }
 0x527   :  { %1284 = vmatprep.subr.mxu0 %v3256_v46  ;;  %2158 = vmatprep.subr.mxu1 %v3763_v53 }
 0x528   :  { %1285 = vmatpush1.msra.mxu0 %v3263_v22  ;;  %2159 = vmatpush3.msra.mxu1 %v3450_v63 }
 0x529   :  { %1286 = vmatprep.subr.mxu0 %v3270_v47  ;;  %2160 = vmatprep.subr.mxu1 %v3763_v53 }
 0x52a   :  { %1287 = vmatpush1.msra.mxu0 %v3277_v23  ;;  %2161 = vmatpush3.msra.mxu1 %v3459_v55 }
 0x52b   :  { %1288 = vmatprep.subr.mxu0 %v3284_v48  ;;  %2162 = vmatprep.subr.mxu1 %v3763_v53 }
 0x52c   :  { %1289 = vmatpush1.msra.mxu0 %v3291_v25  ;;  %2163 = vmatpush3.msra.mxu1 %v3468_v21 }
 0x52d   :  { %1290 = vmatprep.subr.mxu0 %v3298_v49  ;;  %2164 = vmatprep.subr.mxu1 %v3763_v53 }
 0x52e   :  { %1291 = vmatpush1.msra.mxu0 %v3305_v26  ;;  %2165 = vmatpush3.msra.mxu1 %v3477_v60 }
 0x52f   :  { %1292 = vmatprep.subr.mxu0 %v3312_v1  ;;  %2166 = vmatprep.subr.mxu1 %v3763_v53  ;;  %v107_v1 = vmul.f32 %v3800_v27, %v63_v59 }
 0x530   :  { %1293 = vmatpush1.msra.mxu0 %v3319_v28  ;;  %2167 = vmatpush3.msra.mxu1 %v3486_v51 }
 0x531   :  { %1294 = vmatprep.subr.mxu0 %v3326_v6  ;;  %2168 = vmatprep.subr.mxu1 %v3763_v53  ;;  %v148_v60 = vadd.f32 %v2843_v36, %v107_v1 }
 0x532   :  { %1295 = vmatpush1.msra.mxu0 %v3333_v30  ;;  %1328 = vmatprep.mubr.f32.mxu0 %v3763_v53 }
 0x533   :  { %2169 = vmatpush3.msra.mxu1 %v3496_v12  ;;  %2170 = vmatprep.mubr.msk.f32.mxu1 %vm2387_vm0, %v3763_v53 }
 0x534   :  { %1433 = vmatprep.subr.mxu0 %v3102_v13  ;;  %2173 = vmatprep.subr.mxu1 %v3763_v53 }
 0x5d3   :  { %v1161_v2 = vpop.f32.mrf.mxu0  ;;  %v1232_v50 = vpop.f32.mrf.mxu1 }
 0x5d4   :  { %v1162_v30 = vadd.f32 %v1161_v2, %v3772_v37 }
 0x5d5   :  { %v2137_v6 = vpop.f32.mrf.mxu1  ;;  %v1163_v12 = vpop.f32.mrf.mxu0 }
 0x5d6   :  { %v1236_v51 = vadd.f32 %v1162_v30, %v147_v31  ;;  %v1164_v13 = vadd.f32 %v1163_v12, %v3773_v33  ;;  %v1233_v31 = vadd.f32 %v1232_v50, %v2849_v54  ;;  %v3812_v50 = vld [vmem:[#allocation8_spill] sm:$0xff] }
 0x5d8   :  { %v1761_v28 = vmul.f32 -1.442695, %v1236_v51  ;;  %v1237_v26 = vadd.f32 %v1164_v13, %v148_v60  ;;  %v1618_v13 = vld [vmem:[%s3693_s5 + $0x70] sm:$0xff] }
 0x5da   :  { %2307 = vpow2.f32 %v1761_v28  ;;  %v1762_v49 = vmul.f32 -1.442695, %v1237_v26  ;;  %v149_v28 = vadd.f32 %v2851_v4, %v108_v61  ;;  %v3824_v61 = vld [vmem:[#allocation20_spill] sm:$0xff] }
 0x5dc   :  { %2309 = vpow2.f32 %v1762_v49 }
 0x5e7   :  { %v2308_v15 = vpop.eup %2307 }
 0x5e8   :  { %v1244_v21 = vadd.f32 1.0, %v2308_v15 }
 0x5e9   :  { %v2310_v2 = vpop.eup %2309 }
 0x5ea   :  { %2311 = vrcp.f32 %v1244_v21  ;;  %v1245_v27 = vadd.f32 1.0, %v2310_v2  ;;  %v1617_v2 = vld [vmem:[%s3693_s5 + $0x68] sm:$0xff] }
 0x5f7   :  { %v2312_v6 = vpop.eup %2311 }
 0x5f8   :  { %v1250_v30 = vmul.f32 %v2312_v6, %v1233_v31  ;;  %v1616_v31 = vld [vmem:[%s3693_s5 + $0x60] sm:$0xff]  ;;  %v1615_v6 = vld [vmem:[%s3693_s5 + $0x58] sm:$0xff] }
 0x5fa   :  { %v1251_v51 = vadd.f32 %v1250_v30, %v149_v28  ;;  %v1614_v28 = vld [vmem:[%s3693_s5 + $0x50] sm:$0xff]  ;;  %v1613_v30 = vld [vmem:[%s3693_s5 + $0x48] sm:$0xff] }
 0x5fc   :  { %2313 = vtanh.f32 %v1251_v51  ;;  %v1612_v51 = vld [vmem:[%s3693_s5 + $0x40] sm:$0xff] }
 0x5fd   :  { %2315 = vrcp.f32 %v1245_v27  ;;  %v3813_v27 = vld [vmem:[#allocation4_spill] sm:$0xff] }
 0x609   :  { %v2314_v1 = vpop.eup %2313 }
 0x60a   :  { %v1253_v26 = vsub.f32 %v3352_v57, %v2314_v1  ;;  %v2316_v60 = vpop.eup %2315 }
 0x60c   :  { %v1254_v15 = vmul.f32 %v2316_v60, %v1253_v26  ;;  %v1610_v26 = vld [vmem:[%s3693_s5 + $0x30] sm:$0xff]  ;;  %v1609_v60 = vld [vmem:[%s3693_s5 + $0x28] sm:$0xff] }
 0x60e   :  { %v3513_v49 = vadd.f32 %v2314_v1, %v1254_v15  ;;  %v1611_v1 = vld [vmem:[%s3693_s5 + $0x38] sm:$0xff]  ;;  %v1608_v15 = vld [vmem:[%s3693_s5 + $0x20] sm:$0xff] }
 0x610   :  { %1329 = vmatmul.mubr.f32.vlgmr.msra.gmra.mxu0 %v3513_v49  ;;  %2171 = vmatmul.mubr.f32.vlgmr.msra.gmra.mxu1 %v3513_v49 }
 0x611   :  { %1434 = vmatpush1.msra.mxu0 %v3123_v5  ;;  %2174 = vmatpush3.msra.mxu1 %v3360_v9  ;;  %v3814_v5 = vld [vmem:[#allocation11_spill] sm:$0xff] }
 0x612   :  { %1435 = vmatprep.subr.mxu0 %v3130_v7  ;;  %2175 = vmatprep.subr.mxu1 %v3763_v53  ;;  %v3815_v7 = vld [vmem:[#allocation13_spill] sm:$0xff] }
 0x613   :  { %1436 = vmatpush1.msra.mxu0 %v3137_v8  ;;  %2176 = vmatpush3.msra.mxu1 %v3369_v58  ;;  %v3816_v8 = vld [vmem:[#allocation5_spill] sm:$0xff] }
 0x614   :  { %1437 = vmatprep.subr.mxu0 %v3144_v38  ;;  %2177 = vmatprep.subr.mxu1 %v3763_v53  ;;  %v3817_v38 = vld [vmem:[#allocation6_spill] sm:$0xff] }
 0x615   :  { %1438 = vmatpush1.msra.mxu0 %v3151_v10  ;;  %2178 = vmatpush3.msra.mxu1 %v3378_v24  ;;  %v3818_v10 = vld [vmem:[#allocation9_spill] sm:$0xff] }
 0x616   :  { %1439 = vmatprep.subr.mxu0 %v3158_v39  ;;  %2179 = vmatprep.subr.mxu1 %v3763_v53  ;;  %v3819_v39 = vld [vmem:[#allocation12_spill] sm:$0xff] }
 0x617   :  { %1440 = vmatpush1.msra.mxu0 %v3165_v11  ;;  %2180 = vmatpush3.msra.mxu1 %v3387_v32  ;;  %v3820_v11 = vld [vmem:[#allocation7_spill] sm:$0xff] }
 0x618   :  { %1441 = vmatprep.subr.mxu0 %v3172_v40  ;;  %2181 = vmatprep.subr.mxu1 %v3763_v53  ;;  %v3821_v40 = vld [vmem:[#allocation10_spill] sm:$0xff] }
 0x619   :  { %1442 = vmatpush1.msra.mxu0 %v3179_v14  ;;  %2182 = vmatpush3.msra.mxu1 %v3396_v35  ;;  %v1619_v14 = vld [vmem:[%s3693_s5 + $0x78] sm:$0xff] }
 0x61a   :  { %1443 = vmatprep.subr.mxu0 %v3186_v41  ;;  %2183 = vmatprep.subr.mxu1 %v3763_v53  ;;  %v68_v41 = vpop.permute.xlu0 %67 }
 0x61b   :  { %1444 = vmatpush1.msra.mxu0 %v3193_v16  ;;  %2184 = vmatpush3.msra.mxu1 %v3405_v62  ;;  %v3822_v16 = vld [vmem:[#allocation15_spill] sm:$0xff]  ;;  %v111_v24 = vmul.f32 %v2847_v34, %v68_v41 }
 0x61c   :  { %1445 = vmatprep.subr.mxu0 %v3200_v42  ;;  %2185 = vmatprep.subr.mxu1 %v3763_v53  ;;  %v109_v42 = vmul.f32 %v3822_v16, %v68_v41 }
 0x61d   :  { %1446 = vmatpush1.msra.mxu0 %v3207_v17  ;;  %2186 = vmatpush3.msra.mxu1 %v3414_v29  ;;  %v152_v29 = vadd.f32 %v2851_v4, %v111_v24 }
 0x61e   :  { %1447 = vmatprep.subr.mxu0 %v3214_v43  ;;  %2187 = vmatprep.subr.mxu1 %v3763_v53 }
 0x61f   :  { %1448 = vmatpush1.msra.mxu0 %v3221_v18  ;;  %2188 = vmatpush3.msra.mxu1 %v3423_v0  ;;  %v150_v18 = vadd.f32 %v3771_v56, %v109_v42 }
 0x620   :  { %1449 = vmatprep.subr.mxu0 %v3228_v44  ;;  %2189 = vmatprep.subr.mxu1 %v3763_v53 }
 0x621   :  { %1450 = vmatpush1.msra.mxu0 %v3235_v19  ;;  %2190 = vmatpush3.msra.mxu1 %v3432_v3 }
 0x622   :  { %1451 = vmatprep.subr.mxu0 %v3242_v45  ;;  %2191 = vmatprep.subr.mxu1 %v3763_v53 }
 0x623   :  { %1452 = vmatpush1.msra.mxu0 %v3249_v20  ;;  %2192 = vmatpush3.msra.mxu1 %v3441_v52 }
 0x624   :  { %1453 = vmatprep.subr.mxu0 %v3256_v46  ;;  %2193 = vmatprep.subr.mxu1 %v3763_v53 }
 0x625   :  { %1454 = vmatpush1.msra.mxu0 %v3263_v22  ;;  %2194 = vmatpush3.msra.mxu1 %v3450_v63 }
 0x626   :  { %1455 = vmatprep.subr.mxu0 %v3270_v47  ;;  %2195 = vmatprep.subr.mxu1 %v3763_v53 }
 0x627   :  { %1456 = vmatpush1.msra.mxu0 %v3277_v23  ;;  %2196 = vmatpush3.msra.mxu1 %v3459_v55 }
 0x628   :  { %1457 = vmatprep.subr.mxu0 %v3284_v48  ;;  %2197 = vmatprep.subr.mxu1 %v3763_v53 }
 0x629   :  { %1458 = vmatpush1.msra.mxu0 %v3291_v25  ;;  %2198 = vmatpush3.msra.mxu1 %v3812_v50  ;;  %v1607_v50 = vld [vmem:[%s3693_s5 + $0x18] sm:$0xff] }
 0x62a   :  { %1459 = vmatprep.subr.mxu0 %v3813_v27  ;;  %2199 = vmatprep.subr.mxu1 %v3763_v53  ;;  %v1606_v27 = vld [vmem:[%s3693_s5 + $0x10] sm:$0xff] }
 0x62b   :  { %1460 = vmatpush1.msra.mxu0 %v3814_v5  ;;  %2200 = vmatpush3.msra.mxu1 %v3815_v7  ;;  %v1605_v5 = vld [vmem:[%s3693_s5 + $0x8] sm:$0xff]  ;;  %v1604_v7 = vld [vmem:[%s3693_s5] sm:$0xff] }
 0x62c   :  { %1461 = vmatprep.subr.mxu0 %v3816_v8  ;;  %2201 = vmatprep.subr.mxu1 %v3763_v53  ;;  %v3825_v8 = vld [vmem:[#allocation16_spill] sm:$0xff] }
 0x62d   :  { %1462 = vmatpush1.msra.mxu0 %v3817_v38  ;;  %2202 = vmatpush3.msra.mxu1 %v3818_v10  ;;  %v3826_v38 = vld [vmem:[#allocation17_spill] sm:$0xff]  ;;  %v3827_v10 = vld [vmem:[#allocation19_spill] sm:$0xff] }
 0x62e   :  { %1463 = vmatprep.subr.mxu0 %v3819_v39  ;;  %2203 = vmatprep.subr.mxu1 %v3763_v53  ;;  %v73_v39 = vpop.permute.xlu1 %72 }
 0x62f   :  { %1464 = vmatpush1.msra.mxu0 %v3820_v11  ;;  %1497 = vmatprep.mubr.f32.mxu0 %v3763_v53  ;;  %v112_v11 = vmul.f32 %v3822_v16, %v73_v39 }
 0x630   :  { %2204 = vmatpush3.msra.mxu1 %v3821_v40  ;;  %2205 = vmatprep.mubr.msk.f32.mxu1 %vm2387_vm0, %v3763_v53  ;;  %v3823_v53 = vld [vmem:[#allocation18_spill] sm:$0xff] }
 0x631   :  { %2208 = vmatprep.subr.mxu0 %v1619_v14  ;;  %v110_v22 = vmul.f32 %v3823_v53, %v68_v41  ;;  %v153_v41 = vadd.f32 %v3771_v56, %v112_v11 }
 0x633   :  { %v151_v23 = vadd.f32 %v2843_v36, %v110_v22  ;;  %v114_v22 = vmul.f32 %v2847_v34, %v73_v39 }
 0x6d0   :  { %v1330_v17 = vpop.f32.mrf.mxu0  ;;  %v1401_v43 = vpop.f32.mrf.mxu1 }
 0x6d1   :  { %v1331_v44 = vadd.f32 %v1330_v17, %v3772_v37  ;;  %v1402_v35 = vadd.f32 %v1401_v43, %v2849_v54 }
 0x6d2   :  { %v2172_v19 = vpop.f32.mrf.mxu1  ;;  %v1332_v46 = vpop.f32.mrf.mxu0 }
 0x6d3   :  { %v1405_v45 = vadd.f32 %v1331_v44, %v150_v18  ;;  %v1333_v47 = vadd.f32 %v1332_v46, %v3773_v33 }
 0x6d5   :  { %v1763_v20 = vmul.f32 -1.442695, %v1405_v45  ;;  %v1406_v48 = vadd.f32 %v1333_v47, %v151_v23 }
 0x6d7   :  { %2317 = vpow2.f32 %v1763_v20  ;;  %v1764_v25 = vmul.f32 -1.442695, %v1406_v48 }
 0x6d9   :  { %2319 = vpow2.f32 %v1764_v25 }
 0x6e4   :  { %v2318_v9 = vpop.eup %2317 }
 0x6e5   :  { %v1413_v58 = vadd.f32 1.0, %v2318_v9  ;;  %v155_v9 = vadd.f32 %v2851_v4, %v114_v22 }
 0x6e6   :  { %v2320_v32 = vpop.eup %2319 }
 0x6e7   :  { %2321 = vrcp.f32 %v1413_v58  ;;  %v1414_v52 = vadd.f32 1.0, %v2320_v32 }
 0x6f4   :  { %v2322_v62 = vpop.eup %2321 }
 0x6f5   :  { %v1419_v0 = vmul.f32 %v2322_v62, %v1402_v35 }
 0x6f7   :  { %v1420_v3 = vadd.f32 %v1419_v0, %v152_v29 }
 0x6f9   :  { %2323 = vtanh.f32 %v1420_v3 }
 0x6fa   :  { %2325 = vrcp.f32 %v1414_v52 }
 0x706   :  { %v2324_v63 = vpop.eup %2323 }
 0x707   :  { %v1422_v55 = vsub.f32 %v3513_v49, %v2324_v63  ;;  %v2326_v21 = vpop.eup %2325 }
 0x709   :  { %v1423_v12 = vmul.f32 %v2326_v21, %v1422_v55 }
 0x70b   :  { %v3595_v59 = vadd.f32 %v2324_v63, %v1423_v12 }
 0x70d   :  { %1498 = vmatmul.mubr.f32.vlgmr.msra.gmra.mxu0 %v3595_v59  ;;  %2206 = vmatmul.mubr.f32.vlgmr.msra.gmra.mxu1 %v3595_v59 }
 0x70e   :  { %2209 = vmatpush3.msra.mxu0 %v1619_v14  ;;  %2240 = vmatprep.mubr.f32.mxu0 %v3824_v61 }
 0x70f   :  { %2210 = vmatprep.subr.mxu0 %v1618_v13 }
 0x710   :  { %2211 = vmatpush3.msra.mxu0 %v1618_v13 }
 0x711   :  { %2212 = vmatprep.subr.mxu0 %v1617_v2 }
 0x712   :  { %2213 = vmatpush3.msra.mxu0 %v1617_v2 }
 0x713   :  { %2214 = vmatprep.subr.mxu0 %v1616_v31 }
 0x714   :  { %2215 = vmatpush3.msra.mxu0 %v1616_v31 }
 0x715   :  { %2216 = vmatprep.subr.mxu0 %v1615_v6 }
 0x716   :  { %2217 = vmatpush3.msra.mxu0 %v1615_v6 }
 0x717   :  { %2218 = vmatprep.subr.mxu0 %v1614_v28 }
 0x718   :  { %2219 = vmatpush3.msra.mxu0 %v1614_v28 }
 0x719   :  { %2220 = vmatprep.subr.mxu0 %v1613_v30 }
 0x71a   :  { %2221 = vmatpush3.msra.mxu0 %v1613_v30 }
 0x71b   :  { %2222 = vmatprep.subr.mxu0 %v1612_v51 }
 0x71c   :  { %2223 = vmatpush3.msra.mxu0 %v1612_v51 }
 0x71d   :  { %2224 = vmatprep.subr.mxu0 %v1611_v1 }
 0x71e   :  { %2225 = vmatpush3.msra.mxu0 %v1611_v1 }
 0x71f   :  { %2226 = vmatprep.subr.mxu0 %v1610_v26 }
 0x720   :  { %2227 = vmatpush3.msra.mxu0 %v1610_v26 }
 0x721   :  { %2228 = vmatprep.subr.mxu0 %v1609_v60 }
 0x722   :  { %2229 = vmatpush3.msra.mxu0 %v1609_v60 }
 0x723   :  { %2230 = vmatprep.subr.mxu0 %v1608_v15 }
 0x724   :  { %2231 = vmatpush3.msra.mxu0 %v1608_v15 }
 0x725   :  { %2232 = vmatprep.subr.mxu0 %v1607_v50 }
 0x726   :  { %2233 = vmatpush3.msra.mxu0 %v1607_v50 }
 0x727   :  { %2234 = vmatprep.subr.mxu0 %v1606_v27 }
 0x728   :  { %2235 = vmatpush3.msra.mxu0 %v1606_v27 }
 0x729   :  { %2236 = vmatprep.subr.mxu0 %v1605_v5 }
 0x72a   :  { %2237 = vmatpush3.msra.mxu0 %v1605_v5 }
 0x72b   :  { %2238 = vmatprep.subr.mxu0 %v1604_v7 }
 0x72c   :  { %2239 = vmatpush3.msra.mxu0 %v1604_v7 }
 0x72d   :  { %2241 = vmatmul.mubr.f32.vlgmr.msra.gmra.mxu0 %v3825_v8 }
 0x72e   :  { %2243 = vmatprep.mubr.f32.mxu0 %v3826_v38 }
 0x731   :  { %2244 = vmatmul.mubr.f32.gmra.mxu0 %v3827_v10 }
 0x732   :  { %2246 = vmatprep.mubr.f32.mxu0 %v3352_v57  ;;  %v113_v57 = vmul.f32 %v3823_v53, %v73_v39 }
 0x734   :  { %v154_v19 = vadd.f32 %v2843_v36, %v113_v57 }
 0x735   :  { %2247 = vmatmul.mubr.f32.gmra.mxu0 %v3513_v49 }
 0x736   :  { %2249 = vmatprep.mubr.f32.mxu0 %v3595_v59 }
 0x7cd   :  { %v1499_v40 = vpop.f32.mrf.mxu0  ;;  %v1570_v14 = vpop.f32.mrf.mxu1 }
 0x7ce   :  { %v1500_v42 = vadd.f32 %v1499_v40, %v3772_v37  ;;  %v1767_v37 = vld [vmem:[%s3694_s6] ss:$0 sm:$0xff] }
 0x7cf   :  { %v2207_v17 = vpop.f32.mrf.mxu1  ;;  %v1501_v44 = vpop.f32.mrf.mxu0 }
 0x7d0   :  { %v1574_v43 = vadd.f32 %v1500_v42, %v153_v41  ;;  %v1502_v49 = vadd.f32 %v1501_v44, %v3773_v33  ;;  %v1571_v33 = vadd.f32 %v1570_v14, %v2849_v54 }
 0x7d2   :  { %v1765_v18 = vmul.f32 -1.442695, %v1574_v43  ;;  %v1575_v45 = vadd.f32 %v1502_v49, %v154_v19 }
 0x7d4   :  { %2327 = vpow2.f32 %v1765_v18  ;;  %v1766_v20 = vmul.f32 -1.442695, %v1575_v45 }
 0x7d6   :  { %2329 = vpow2.f32 %v1766_v20 }
 0x7e1   :  { %v2328_v16 = vpop.eup %2327 }
 0x7e2   :  { %v1582_v46 = vadd.f32 1.0, %v2328_v16 }
 0x7e3   :  { %v2330_v53 = vpop.eup %2329 }
 0x7e4   :  { %2331 = vrcp.f32 %v1582_v46  ;;  %v1583_v35 = vadd.f32 1.0, %v2330_v53 }
 0x7ed   :  { %v2242_v56 = vpop.f32.mrf.mxu0 }
 0x7ee   :  { %v1699_v47 = vadd.f32 %v2242_v56, %v1767_v37 }
 0x7ef   :  { %v1693_v23 = vpop.f32.mrf.mxu0 }
 0x7f0   :  { %1733 = vst [vmem:[%s3695_s7 + $0x8] sm:$0xff] %v1699_v47  ;;  %v1694_v36 = vadd.f32 %v1767_v37, %v1693_v23 }
 0x7f1   :  { %v2332_v48 = vpop.eup %2331  ;;  %v2245_v25 = vpop.f32.mrf.mxu0 }
 0x7f2   :  { %v1588_v58 = vmul.f32 %v2332_v48, %v1571_v33  ;;  %1732 = vst [vmem:[%s3695_s7] sm:$0xff] %v1694_v36  ;;  %v1709_v34 = vadd.f32 %v2245_v25, %v1767_v37 }
 0x7f3   :  { %v1703_v24 = vpop.f32.mrf.mxu0 }
 0x7f4   :  { %v1589_v32 = vadd.f32 %v1588_v58, %v155_v9  ;;  %1735 = vst [vmem:[%s3695_s7 + $0x18] sm:$0xff] %v1709_v34  ;;  %v1704_v54 = vadd.f32 %v1767_v37, %v1703_v24 }
 0x7f5   :  { %v2248_v62 = vpop.f32.mrf.mxu0 }
 0x7f6   :  { %2333 = vtanh.f32 %v1589_v32  ;;  %1734 = vst [vmem:[%s3695_s7 + $0x10] sm:$0xff] %v1704_v54  ;;  %v1719_v4 = vadd.f32 %v2248_v62, %v1767_v37 }
 0x7f7   :  { %v1713_v29 = vpop.f32.mrf.mxu0  ;;  %2335 = vrcp.f32 %v1583_v35 }
 0x7f8   :  { %1737 = vst [vmem:[%s3695_s7 + $0x28] sm:$0xff] %v1719_v4  ;;  %v1714_v0 = vadd.f32 %v1767_v37, %v1713_v29 }
 0x7fa   :  { %1736 = vst [vmem:[%s3695_s7 + $0x20] sm:$0xff] %v1714_v0 }
 0x803   :  { %v2334_v3 = vpop.eup %2333 }
 0x804   :  { %v1591_v52 = vsub.f32 %v3595_v59, %v2334_v3  ;;  %v2336_v63 = vpop.eup %2335 }
 0x806   :  { %v1592_v55 = vmul.f32 %v2336_v63, %v1591_v52 }
 0x808   :  { %v1593_v21 = vadd.f32 %v2334_v3, %v1592_v55 }
 0x80a   :  { %2250 = vmatmul.mubr.f32.gmra.mxu0 %v1593_v21 }
 0x8ca   :  { %v2251_v12 = vpop.f32.mrf.mxu0 }
 0x8cb   :  { %v1729_v13 = vadd.f32 %v2251_v12, %v1767_v37 }
 0x8cc   :  { %v1723_v61 = vpop.f32.mrf.mxu0 }
 0x8cd   :  { %1739 = vst [vmem:[%s3695_s7 + $0x38] sm:$0xff] %v1729_v13  ;;  %v1724_v2 = vadd.f32 %v1767_v37, %v1723_v61 }
 0x8cf   :  { %1738 = vst [vmem:[%s3695_s7 + $0x30] sm:$0xff] %v1724_v2 }

</bundles_post_ra>
